<compile_context>
chip_gen: v5e
topology: v5e:2x2
jax: 0.10.0
libtpu: 0.0.40
codegen_flags: <defaults>
</compile_context>

<pallas_src>
import functools

import jax
import jax.numpy as jnp
from jax import lax
from jax.experimental import pallas as pl
from jax.experimental.pallas import tpu as pltpu


# ----------------------------------------------------------------------------
# Fused matmul + bias (+ ReLU) Pallas kernel: bf16 operands, f32 accumulation.
# ----------------------------------------------------------------------------
def _matmul_bias_kernel(a_ref, b_ref, bias_ref, o_ref, acc_ref, *, relu):
    @pl.when(pl.program_id(2) == 0)
    def _():
        acc_ref[...] = jnp.zeros_like(acc_ref)

    acc_ref[...] += jnp.dot(a_ref[...], b_ref[...],
                            preferred_element_type=jnp.float32)

    @pl.when(pl.program_id(2) == pl.num_programs(2) - 1)
    def _():
        r = acc_ref[...] + bias_ref[...]
        if relu:
            r = jnp.maximum(r, 0.0)
        o_ref[...] = r.astype(o_ref.dtype)


def _round_up(x, m):
    return ((x + m - 1) // m) * m


def _choose_tiles(M, K, N):
    """Tile selection.

    * N (lane) tile is 128-aligned; N is padded to a 128 multiple.
    * K is NEVER padded: use a 128-multiple tile when K allows, otherwise a
      single full-K block (block dim == full array dim is always legal).
    * M (sublane) is rounded to a multiple of 16 (bf16 sublane packing) and we
      prefer >=2 M blocks so dual-TensorCore chips (v7x) shard the 'parallel'
      axis across both cores.  Tiles capped at 512x256: safe on v5e/v6e/v7x.
    """
    Np = _round_up(N, 128)
    tn = 256 if Np % 256 == 0 else 128

    if K % 128 == 0:
        tk = next(t for t in (512, 256, 128) if K % t == 0)
    else:
        tk = K                     # full-K, single K grid step, no zero pad

    Mp = _round_up(M, 16)
    if Mp <= 128:
        tm = Mp
    else:
        tm = None
        for t in (512, 256, 128):  # smallest-waste tile that yields >=2 blocks
            if t < Mp and _round_up(Mp, t) - Mp <= Mp // 8:
                tm = t
                break
        if tm is None:
            tm = Mp if Mp <= 512 else 512
        Mp = _round_up(Mp, tm)
    return tm, tk, tn, Mp, K, Np


def matmul_bias(x, w, b, *, relu=False, out_dtype=jnp.bfloat16):
    """out = relu(x @ w + b); x:[M,K], w:[K,N], b:[N].

    bf16 operands on the MXU, f32 accumulation, f32 bias+ReLU epilogue, output
    cast to `out_dtype` (bf16 by default to halve HBM writeback).
    """
    M, K = x.shape
    K2, N = w.shape
    assert K == K2
    tm, tk, tn, Mp, Kp, Np = _choose_tiles(M, K, N)

    a = x if x.dtype == jnp.bfloat16 else x.astype(jnp.bfloat16)
    wv = w if w.dtype == jnp.bfloat16 else w.astype(jnp.bfloat16)
    bias = b.astype(jnp.float32).reshape(1, N)
    if Mp != M:
        a = jnp.pad(a, ((0, Mp - M), (0, 0)))
    if Np != N:
        wv = jnp.pad(wv, ((0, 0), (0, Np - N)))
        bias = jnp.pad(bias, ((0, 0), (0, Np - N)))

    gi, gj, gk = Mp // tm, Np // tn, Kp // tk
    out_bytes = jnp.dtype(out_dtype).itemsize
    cost = pl.CostEstimate(
        flops=2 * Mp * Np * Kp,
        transcendentals=0,
        # A is re-read once per N block, B once per M block.
        bytes_accessed=(Mp * Kp * 2) * gj + (Kp * Np * 2) * gi
                       + Np * 4 + Mp * Np * out_bytes)

    out = pl.pallas_call(
        functools.partial(_matmul_bias_kernel, relu=relu),
        out_shape=jax.ShapeDtypeStruct((Mp, Np), out_dtype),
        grid_spec=pltpu.PrefetchScalarGridSpec(
            num_scalar_prefetch=0,
            grid=(gi, gj, gk),
            in_specs=[
                pl.BlockSpec((tm, tk), lambda i, j, k: (i, k)),
                pl.BlockSpec((tk, tn), lambda i, j, k: (k, j)),
                pl.BlockSpec((1, tn), lambda i, j, k: (0, j)),
            ],
            out_specs=pl.BlockSpec((tm, tn), lambda i, j, k: (i, j)),
            scratch_shapes=[pltpu.VMEM((tm, tn), jnp.float32)],
        ),
        compiler_params=pltpu.CompilerParams(
            dimension_semantics=("parallel", "parallel", "arbitrary"),
            vmem_limit_bytes=32 * 1024 * 1024),
        cost_estimate=cost,
    )(a, wv, bias)

    if (Mp, Np) != (M, N):
        out = out[:M, :N]
    return out


# ----------------------------------------------------------------------------
# NHWC conv helpers (stride 1); weights arrive already reshaped + bf16.
# ----------------------------------------------------------------------------
def conv1x1(x, w_mat, b, *, relu=True, out_dtype=jnp.bfloat16):
    """x:[N,H,W,Cin] (bf16); w_mat:[Cin,Cout]."""
    N, H, W, Cin = x.shape
    y = matmul_bias(x.reshape(N * H * W, Cin), w_mat, b,
                    relu=relu, out_dtype=out_dtype)
    return y.reshape(N, H, W, -1)


def conv_kxk(x, w_mat, b, *, k, pad, relu=True, out_dtype=jnp.bfloat16):
    """x:[N,H,W,Cin] (bf16); w_mat:[k*k*Cin,Cout] with (i,j,c) patch ordering."""
    N, H, W, Cin = x.shape
    xp = jnp.pad(x, ((0, 0), (pad, pad), (pad, pad), (0, 0)))
    Ho = H + 2 * pad - k + 1
    Wo = W + 2 * pad - k + 1
    # channel-last im2col in bf16: concat along C, flatten is layout-free.
    cols = [xp[:, i:i + Ho, j:j + Wo, :] for i in range(k) for j in range(k)]
    patches = jnp.concatenate(cols, axis=-1).reshape(N * Ho * Wo, k * k * Cin)
    y = matmul_bias(patches, w_mat, b, relu=relu, out_dtype=out_dtype)
    return y.reshape(N, Ho, Wo, -1)


# ----------------------------------------------------------------------------
# One-time weight preparation (bf16, transposed/reshaped, 1x1s fused on Cout)
# ----------------------------------------------------------------------------
def prepare_params(p):
    def mat_1x1(w):                       # [Cout,Cin,1,1] -> [Cin,Cout] bf16
        cout, cin = w.shape[0], w.shape[1]
        return jnp.transpose(w.reshape(cout, cin)).astype(jnp.bfloat16)

    def mat_kxk(w):                       # [Cout,Cin,k,k] -> [k*k*Cin,Cout]
        cout, cin, kh, kw = w.shape
        return (jnp.transpose(w, (2, 3, 1, 0))
                .reshape(kh * kw * cin, cout).astype(jnp.bfloat16))

    w_fused = jnp.concatenate(
        [mat_1x1(p['b1']['w']), mat_1x1(p['b2_1']['w']),
         mat_1x1(p['b3_1']['w'])], axis=1)
    b_fused = jnp.concatenate(
        [p['b1']['b'], p['b2_1']['b'], p['b3_1']['b']]).astype(jnp.float32)

    prep = {
        'fused': {'w': w_fused, 'b': b_fused},
        'b2_2': {'w': mat_kxk(p['b2_2']['w']),
                 'b': p['b2_2']['b'].astype(jnp.float32)},
        'b3_2': {'w': mat_kxk(p['b3_2']['w']),
                 'b': p['b3_2']['b'].astype(jnp.float32)},
        'b4': {'w': mat_1x1(p['b4']['w']),
               'b': p['b4']['b'].astype(jnp.float32)},
    }
    splits = (p['b1']['w'].shape[0], p['b2_1']['w'].shape[0],
              p['b3_1']['w'].shape[0])
    return prep, splits


# ----------------------------------------------------------------------------
# Inception block forward (PyTorch semantics: NCHW f32 in, NCHW f32 out)
# ----------------------------------------------------------------------------
def inception_forward(x_nchw, prep, splits):
    # One NCHW->NHWC transpose and one bf16 cast for the whole block.
    x = jnp.transpose(x_nchw, (0, 2, 3, 1)).astype(jnp.bfloat16)
    N, H, W, Cin = x.shape
    c1, c2, c3 = splits

    # Fused 1x1 convs sharing the block input: branch1 | 3x3-reduce | 5x5-reduce
    y = matmul_bias(x.reshape(N * H * W, Cin), prep['fused']['w'],
                    prep['fused']['b'], relu=True, out_dtype=jnp.bfloat16)
    y = y.reshape(N, H, W, c1 + c2 + c3)
    branch1 = y[..., :c1]
    b2_red = y[..., c1:c1 + c2]
    b3_red = y[..., c1 + c2:]

    branch2 = conv_kxk(b2_red, prep['b2_2']['w'], prep['b2_2']['b'],
                       k=3, pad=1, relu=True)
    branch3 = conv_kxk(b3_red, prep['b3_2']['w'], prep['b3_2']['b'],
                       k=5, pad=2, relu=True)

    # Pool branch: MaxPool2d(3, stride=1, padding=1) in bf16 + 1x1 conv.
    xpool = lax.reduce_window(
        x, jnp.array(-jnp.inf, x.dtype), lax.max,
        (1, 3, 3, 1), (1, 1, 1, 1),
        ((0, 0), (1, 1), (1, 1), (0, 0)))
    branch4 = conv1x1(xpool, prep['b4']['w'], prep['b4']['b'], relu=True)

    out = jnp.concatenate([branch1, branch2, branch3, branch4], axis=-1)
    # Back to NCHW; f32 at the module boundary to match PyTorch output dtype.
    return jnp.transpose(out, (0, 3, 1, 2)).astype(jnp.float32)


def make_inception_forward(params):
    prep, splits = prepare_params(params)   # staged once, outside the jit

    def fwd(x_nchw):
        return inception_forward(x_nchw, prep, splits)

    return jax.jit(fwd)


# ----------------------------------------------------------------------------
# Pure-JAX reference (f32) for a correctness sanity check
# ----------------------------------------------------------------------------
def inception_ref(x, p):
    def conv(xi, w, b, pad):
        y = lax.conv_general_dilated(
            xi, w, (1, 1), [(pad, pad), (pad, pad)],
            dimension_numbers=('NCHW', 'OIHW', 'NCHW'))
        return jnp.maximum(y + b[None, :, None, None], 0.0)

    b1 = conv(x, p['b1']['w'], p['b1']['b'], 0)
    b2 = conv(conv(x, p['b2_1']['w'], p['b2_1']['b'], 0),
              p['b2_2']['w'], p['b2_2']['b'], 1)
    b3 = conv(conv(x, p['b3_1']['w'], p['b3_1']['b'], 0),
              p['b3_2']['w'], p['b3_2']['b'], 2)
    xpool = lax.reduce_window(
        x, jnp.array(-jnp.inf, x.dtype), lax.max,
        (1, 1, 3, 3), (1, 1, 1, 1),
        ((0, 0), (0, 0), (1, 1), (1, 1)))
    b4 = conv(xpool, p['b4']['w'], p['b4']['b'], 0)
    return jnp.concatenate([b1, b2, b3, b4], axis=1)


# ----------------------------------------------------------------------------
# Deterministic parameter construction (matches Inception.__init__ shapes)
# ----------------------------------------------------------------------------
def init_params(key, in_ch, ch1x1, ch3x3red, ch3x3, ch5x5red, ch5x5, pool_proj):
    keys = iter(jax.random.split(key, 16))

    def conv_p(cout, cin, k):
        fan_in = cin * k * k
        w = jax.random.normal(next(keys), (cout, cin, k, k), jnp.float32)
        w = w * jnp.sqrt(2.0 / fan_in)
        b = jax.random.uniform(next(keys), (cout,), jnp.float32,
                               minval=-0.1, maxval=0.1)
        return {'w': w, 'b': b}

    return {
        'b1':   conv_p(ch1x1, in_ch, 1),
        'b2_1': conv_p(ch3x3red, in_ch, 1),
        'b2_2': conv_p(ch3x3, ch3x3red, 3),
        'b3_1': conv_p(ch5x5red, in_ch, 1),
        'b3_2': conv_p(ch5x5, ch5x5red, 5),
        'b4':   conv_p(pool_proj, in_ch, 1),
    }


if __name__ == "__main__":
    key = jax.random.PRNGKey(0)
    pkey, xkey = jax.random.split(key)

    in_ch = 16
    ch1x1, ch3x3red, ch3x3, ch5x5red, ch5x5, pool_proj = 16, 16, 32, 8, 16, 16
    params = init_params(pkey, in_ch, ch1x1, ch3x3red, ch3x3, ch5x5red, ch5x5,
                         pool_proj)

    x = jax.random.normal(xkey, (2, in_ch, 16, 16), jnp.float32)

    fwd = make_inception_forward(params)
    out = jax.block_until_ready(fwd(x))

    cout_total = ch1x1 + ch3x3 + ch5x5 + pool_proj
    assert out.shape == (2, cout_total, 16, 16), out.shape
    assert bool(jnp.all(jnp.isfinite(out)))

    ref = jax.block_until_ready(jax.jit(inception_ref)(x, params))
    max_err = float(jnp.max(jnp.abs(out - ref)))
    assert bool(jnp.allclose(out, ref, atol=1e-1, rtol=5e-2)), max_err

    print("KERNEL_OK")
</pallas_src>

<mosaic_0001>
module attributes {stable_mosaic.version = 11 : i64} {
  func.func @_matmul_bias_kernel(%arg0: i32, %arg1: i32, %arg2: i32, %arg3: memref<256x16xbf16, #tpu.memory_space<vmem>>, %arg4: memref<16x128xbf16, #tpu.memory_space<vmem>>, %arg5: memref<1x128xf32, #tpu.memory_space<vmem>>, %arg6: memref<256x128xbf16, #tpu.memory_space<vmem>>, %arg7: memref<256x128xf32, #tpu.memory_space<vmem>>) attributes {dimension_semantics = [#tpu.dimension_semantics<parallel>, #tpu.dimension_semantics<parallel>, #tpu.dimension_semantics<arbitrary>], iteration_bounds = array<i64: 2, 1, 1>, scalar_prefetch = 0 : i64, scratch_operands = 1 : i64, tpu.core_type = #tpu.core_type<tc>, window_params = [{transform_indices = @transform_0, window_bounds = array<i64: 256, 16>}, {transform_indices = @transform_1, window_bounds = array<i64: 16, 128>}, {transform_indices = @transform_2, window_bounds = array<i64: 1, 128>}, {transform_indices = @transform_3, window_bounds = array<i64: 256, 128>}]} {
    %c0_i32 = arith.constant 0 : i32
    %0 = arith.cmpi eq, %arg2, %c0_i32 : i32
    %1 = arith.extui %0 : i1 to i32
    %c0_i32_0 = arith.constant 0 : i32
    %2 = arith.cmpi ne, %1, %c0_i32_0 : i32
    scf.if %2 {
      %cst_10 = arith.constant 0.000000e+00 : f32
      %12 = vector.broadcast %cst_10 : f32 to vector<256x128xf32>
      %c0_11 = arith.constant 0 : index
      %c0_12 = arith.constant 0 : index
      %13 = vector.load %arg7[%c0_11, %c0_12] : memref<256x128xf32, #tpu.memory_space<vmem>>, vector<256x128xf32>
      tpu.vector_store %arg7[%c0_11, %c0_12], %12 {strides = array<i32>} : memref<256x128xf32, #tpu.memory_space<vmem>>, vector<256x128xf32>,
    } else {
    }
    %c0 = arith.constant 0 : index
    %c0_1 = arith.constant 0 : index
    %3 = vector.load %arg7[%c0, %c0_1] : memref<256x128xf32, #tpu.memory_space<vmem>>, vector<256x128xf32>
    %c0_2 = arith.constant 0 : index
    %c0_3 = arith.constant 0 : index
    %4 = vector.load %arg3[%c0_2, %c0_3] : memref<256x16xbf16, #tpu.memory_space<vmem>>, vector<256x16xbf16>
    %c0_4 = arith.constant 0 : index
    %c0_5 = arith.constant 0 : index
    %5 = vector.load %arg4[%c0_4, %c0_5] : memref<16x128xbf16, #tpu.memory_space<vmem>>, vector<16x128xbf16>
    %cst = arith.constant dense<0.000000e+00> : vector<256x128xf32>
    %6 = tpu.matmul %4, %5, %cst {dimension_numbers = #tpu.dot_dimension_numbers<[1], [0], [0], [1], [0, 0, 1, 1], [], []>} : vector<256x16xbf16>, vector<16x128xbf16>, vector<256x128xf32> -> vector<256x128xf32>
    %7 = arith.addf %3, %6 : vector<256x128xf32>
    %c0_6 = arith.constant 0 : index
    %c0_7 = arith.constant 0 : index
    %8 = vector.load %arg7[%c0_6, %c0_7] : memref<256x128xf32, #tpu.memory_space<vmem>>, vector<256x128xf32>
    tpu.vector_store %arg7[%c0_6, %c0_7], %7 {strides = array<i32>} : memref<256x128xf32, #tpu.memory_space<vmem>>, vector<256x128xf32>,
    %c0_i32_8 = arith.constant 0 : i32
    %9 = arith.cmpi eq, %arg2, %c0_i32_8 : i32
    %10 = arith.extui %9 : i1 to i32
    %c0_i32_9 = arith.constant 0 : i32
    %11 = arith.cmpi ne, %10, %c0_i32_9 : i32
    scf.if %11 {
      %c0_10 = arith.constant 0 : index
      %c0_11 = arith.constant 0 : index
      %12 = vector.load %arg7[%c0_10, %c0_11] : memref<256x128xf32, #tpu.memory_space<vmem>>, vector<256x128xf32>
      %c0_12 = arith.constant 0 : index
      %c0_13 = arith.constant 0 : index
      %13 = vector.load %arg5[%c0_12, %c0_13] : memref<1x128xf32, #tpu.memory_space<vmem>>, vector<1x128xf32>
      %14 = vector.broadcast %13 : vector<1x128xf32> to vector<256x128xf32>
      %15 = arith.addf %12, %14 : vector<256x128xf32>
      %cst_14 = arith.constant 0.000000e+00 : f32
      %16 = vector.broadcast %cst_14 : f32 to vector<256x128xf32>
      %17 = arith.maximumf %15, %16 : vector<256x128xf32>
      %18 = arith.truncf %17 : vector<256x128xf32> to vector<256x128xbf16>
      %c0_15 = arith.constant 0 : index
      %c0_16 = arith.constant 0 : index
      %19 = vector.load %arg6[%c0_15, %c0_16] : memref<256x128xbf16, #tpu.memory_space<vmem>>, vector<256x128xbf16>
      tpu.vector_store %arg6[%c0_15, %c0_16], %18 {strides = array<i32>} : memref<256x128xbf16, #tpu.memory_space<vmem>>, vector<256x128xbf16>,
    } else {
    }
    return
  }
  func.func @transform_0(%arg0: i32, %arg1: i32, %arg2: i32) -> (i32, i32) {
    %c0_i32 = arith.constant 0 : i32
    return %arg0, %arg2 : i32, i32
  }
  func.func @transform_1(%arg0: i32, %arg1: i32, %arg2: i32) -> (i32, i32) {
    %c0_i32 = arith.constant 0 : i32
    return %arg2, %arg1 : i32, i32
  }
  func.func @transform_2(%arg0: i32, %arg1: i32, %arg2: i32) -> (i32, i32) {
    %c0_i32 = arith.constant 0 : i32
    %c0_i32_0 = arith.constant 0 : i32
    return %c0_i32, %arg1 : i32, i32
  }
  func.func @transform_3(%arg0: i32, %arg1: i32, %arg2: i32) -> (i32, i32) {
    %c0_i32 = arith.constant 0 : i32
    return %arg0, %arg1 : i32, i32
  }
}

module attributes {stable_mosaic.version = 11 : i64} {
  func.func @_matmul_bias_kernel(%arg0: i32, %arg1: i32, %arg2: i32, %arg3: memref<256x200xbf16, #tpu.memory_space<vmem>>, %arg4: memref<200x128xbf16, #tpu.memory_space<vmem>>, %arg5: memref<1x128xf32, #tpu.memory_space<vmem>>, %arg6: memref<256x128xbf16, #tpu.memory_space<vmem>>, %arg7: memref<256x128xf32, #tpu.memory_space<vmem>>) attributes {dimension_semantics = [#tpu.dimension_semantics<parallel>, #tpu.dimension_semantics<parallel>, #tpu.dimension_semantics<arbitrary>], iteration_bounds = array<i64: 2, 1, 1>, scalar_prefetch = 0 : i64, scratch_operands = 1 : i64, tpu.core_type = #tpu.core_type<tc>, window_params = [{transform_indices = @transform_0, window_bounds = array<i64: 256, 200>}, {transform_indices = @transform_1, window_bounds = array<i64: 200, 128>}, {transform_indices = @transform_2, window_bounds = array<i64: 1, 128>}, {transform_indices = @transform_3, window_bounds = array<i64: 256, 128>}]} {
    %c0_i32 = arith.constant 0 : i32
    %0 = arith.cmpi eq, %arg2, %c0_i32 : i32
    %1 = arith.extui %0 : i1 to i32
    %c0_i32_0 = arith.constant 0 : i32
    %2 = arith.cmpi ne, %1, %c0_i32_0 : i32
    scf.if %2 {
      %cst_10 = arith.constant 0.000000e+00 : f32
      %12 = vector.broadcast %cst_10 : f32 to vector<256x128xf32>
      %c0_11 = arith.constant 0 : index
      %c0_12 = arith.constant 0 : index
      %13 = vector.load %arg7[%c0_11, %c0_12] : memref<256x128xf32, #tpu.memory_space<vmem>>, vector<256x128xf32>
      tpu.vector_store %arg7[%c0_11, %c0_12], %12 {strides = array<i32>} : memref<256x128xf32, #tpu.memory_space<vmem>>, vector<256x128xf32>,
    } else {
    }
    %c0 = arith.constant 0 : index
    %c0_1 = arith.constant 0 : index
    %3 = vector.load %arg7[%c0, %c0_1] : memref<256x128xf32, #tpu.memory_space<vmem>>, vector<256x128xf32>
    %c0_2 = arith.constant 0 : index
    %c0_3 = arith.constant 0 : index
    %4 = vector.load %arg3[%c0_2, %c0_3] : memref<256x200xbf16, #tpu.memory_space<vmem>>, vector<256x200xbf16>
    %c0_4 = arith.constant 0 : index
    %c0_5 = arith.constant 0 : index
    %5 = vector.load %arg4[%c0_4, %c0_5] : memref<200x128xbf16, #tpu.memory_space<vmem>>, vector<200x128xbf16>
    %cst = arith.constant dense<0.000000e+00> : vector<256x128xf32>
    %6 = tpu.matmul %4, %5, %cst {dimension_numbers = #tpu.dot_dimension_numbers<[1], [0], [0], [1], [0, 0, 1, 1], [], []>} : vector<256x200xbf16>, vector<200x128xbf16>, vector<256x128xf32> -> vector<256x128xf32>
    %7 = arith.addf %3, %6 : vector<256x128xf32>
    %c0_6 = arith.constant 0 : index
    %c0_7 = arith.constant 0 : index
    %8 = vector.load %arg7[%c0_6, %c0_7] : memref<256x128xf32, #tpu.memory_space<vmem>>, vector<256x128xf32>
    tpu.vector_store %arg7[%c0_6, %c0_7], %7 {strides = array<i32>} : memref<256x128xf32, #tpu.memory_space<vmem>>, vector<256x128xf32>,
    %c0_i32_8 = arith.constant 0 : i32
    %9 = arith.cmpi eq, %arg2, %c0_i32_8 : i32
    %10 = arith.extui %9 : i1 to i32
    %c0_i32_9 = arith.constant 0 : i32
    %11 = arith.cmpi ne, %10, %c0_i32_9 : i32
    scf.if %11 {
      %c0_10 = arith.constant 0 : index
      %c0_11 = arith.constant 0 : index
      %12 = vector.load %arg7[%c0_10, %c0_11] : memref<256x128xf32, #tpu.memory_space<vmem>>, vector<256x128xf32>
      %c0_12 = arith.constant 0 : index
      %c0_13 = arith.constant 0 : index
      %13 = vector.load %arg5[%c0_12, %c0_13] : memref<1x128xf32, #tpu.memory_space<vmem>>, vector<1x128xf32>
      %14 = vector.broadcast %13 : vector<1x128xf32> to vector<256x128xf32>
      %15 = arith.addf %12, %14 : vector<256x128xf32>
      %cst_14 = arith.constant 0.000000e+00 : f32
      %16 = vector.broadcast %cst_14 : f32 to vector<256x128xf32>
      %17 = arith.maximumf %15, %16 : vector<256x128xf32>
      %18 = arith.truncf %17 : vector<256x128xf32> to vector<256x128xbf16>
      %c0_15 = arith.constant 0 : index
      %c0_16 = arith.constant 0 : index
      %19 = vector.load %arg6[%c0_15, %c0_16] : memref<256x128xbf16, #tpu.memory_space<vmem>>, vector<256x128xbf16>
      tpu.vector_store %arg6[%c0_15, %c0_16], %18 {strides = array<i32>} : memref<256x128xbf16, #tpu.memory_space<vmem>>, vector<256x128xbf16>,
    } else {
    }
    return
  }
  func.func @transform_0(%arg0: i32, %arg1: i32, %arg2: i32) -> (i32, i32) {
    %c0_i32 = arith.constant 0 : i32
    return %arg0, %arg2 : i32, i32
  }
  func.func @transform_1(%arg0: i32, %arg1: i32, %arg2: i32) -> (i32, i32) {
    %c0_i32 = arith.constant 0 : i32
    return %arg2, %arg1 : i32, i32
  }
  func.func @transform_2(%arg0: i32, %arg1: i32, %arg2: i32) -> (i32, i32) {
    %c0_i32 = arith.constant 0 : i32
    %c0_i32_0 = arith.constant 0 : i32
    return %c0_i32, %arg1 : i32, i32
  }
  func.func @transform_3(%arg0: i32, %arg1: i32, %arg2: i32) -> (i32, i32) {
    %c0_i32 = arith.constant 0 : i32
    return %arg0, %arg1 : i32, i32
  }
}

module attributes {stable_mosaic.version = 11 : i64} {
  func.func @_matmul_bias_kernel(%arg0: i32, %arg1: i32, %arg2: i32, %arg3: memref<256x144xbf16, #tpu.memory_space<vmem>>, %arg4: memref<144x128xbf16, #tpu.memory_space<vmem>>, %arg5: memref<1x128xf32, #tpu.memory_space<vmem>>, %arg6: memref<256x128xbf16, #tpu.memory_space<vmem>>, %arg7: memref<256x128xf32, #tpu.memory_space<vmem>>) attributes {dimension_semantics = [#tpu.dimension_semantics<parallel>, #tpu.dimension_semantics<parallel>, #tpu.dimension_semantics<arbitrary>], iteration_bounds = array<i64: 2, 1, 1>, scalar_prefetch = 0 : i64, scratch_operands = 1 : i64, tpu.core_type = #tpu.core_type<tc>, window_params = [{transform_indices = @transform_0, window_bounds = array<i64: 256, 144>}, {transform_indices = @transform_1, window_bounds = array<i64: 144, 128>}, {transform_indices = @transform_2, window_bounds = array<i64: 1, 128>}, {transform_indices = @transform_3, window_bounds = array<i64: 256, 128>}]} {
    %c0_i32 = arith.constant 0 : i32
    %0 = arith.cmpi eq, %arg2, %c0_i32 : i32
    %1 = arith.extui %0 : i1 to i32
    %c0_i32_0 = arith.constant 0 : i32
    %2 = arith.cmpi ne, %1, %c0_i32_0 : i32
    scf.if %2 {
      %cst_10 = arith.constant 0.000000e+00 : f32
      %12 = vector.broadcast %cst_10 : f32 to vector<256x128xf32>
      %c0_11 = arith.constant 0 : index
      %c0_12 = arith.constant 0 : index
      %13 = vector.load %arg7[%c0_11, %c0_12] : memref<256x128xf32, #tpu.memory_space<vmem>>, vector<256x128xf32>
      tpu.vector_store %arg7[%c0_11, %c0_12], %12 {strides = array<i32>} : memref<256x128xf32, #tpu.memory_space<vmem>>, vector<256x128xf32>,
    } else {
    }
    %c0 = arith.constant 0 : index
    %c0_1 = arith.constant 0 : index
    %3 = vector.load %arg7[%c0, %c0_1] : memref<256x128xf32, #tpu.memory_space<vmem>>, vector<256x128xf32>
    %c0_2 = arith.constant 0 : index
    %c0_3 = arith.constant 0 : index
    %4 = vector.load %arg3[%c0_2, %c0_3] : memref<256x144xbf16, #tpu.memory_space<vmem>>, vector<256x144xbf16>
    %c0_4 = arith.constant 0 : index
    %c0_5 = arith.constant 0 : index
    %5 = vector.load %arg4[%c0_4, %c0_5] : memref<144x128xbf16, #tpu.memory_space<vmem>>, vector<144x128xbf16>
    %cst = arith.constant dense<0.000000e+00> : vector<256x128xf32>
    %6 = tpu.matmul %4, %5, %cst {dimension_numbers = #tpu.dot_dimension_numbers<[1], [0], [0], [1], [0, 0, 1, 1], [], []>} : vector<256x144xbf16>, vector<144x128xbf16>, vector<256x128xf32> -> vector<256x128xf32>
    %7 = arith.addf %3, %6 : vector<256x128xf32>
    %c0_6 = arith.constant 0 : index
    %c0_7 = arith.constant 0 : index
    %8 = vector.load %arg7[%c0_6, %c0_7] : memref<256x128xf32, #tpu.memory_space<vmem>>, vector<256x128xf32>
    tpu.vector_store %arg7[%c0_6, %c0_7], %7 {strides = array<i32>} : memref<256x128xf32, #tpu.memory_space<vmem>>, vector<256x128xf32>,
    %c0_i32_8 = arith.constant 0 : i32
    %9 = arith.cmpi eq, %arg2, %c0_i32_8 : i32
    %10 = arith.extui %9 : i1 to i32
    %c0_i32_9 = arith.constant 0 : i32
    %11 = arith.cmpi ne, %10, %c0_i32_9 : i32
    scf.if %11 {
      %c0_10 = arith.constant 0 : index
      %c0_11 = arith.constant 0 : index
      %12 = vector.load %arg7[%c0_10, %c0_11] : memref<256x128xf32, #tpu.memory_space<vmem>>, vector<256x128xf32>
      %c0_12 = arith.constant 0 : index
      %c0_13 = arith.constant 0 : index
      %13 = vector.load %arg5[%c0_12, %c0_13] : memref<1x128xf32, #tpu.memory_space<vmem>>, vector<1x128xf32>
      %14 = vector.broadcast %13 : vector<1x128xf32> to vector<256x128xf32>
      %15 = arith.addf %12, %14 : vector<256x128xf32>
      %cst_14 = arith.constant 0.000000e+00 : f32
      %16 = vector.broadcast %cst_14 : f32 to vector<256x128xf32>
      %17 = arith.maximumf %15, %16 : vector<256x128xf32>
      %18 = arith.truncf %17 : vector<256x128xf32> to vector<256x128xbf16>
      %c0_15 = arith.constant 0 : index
      %c0_16 = arith.constant 0 : index
      %19 = vector.load %arg6[%c0_15, %c0_16] : memref<256x128xbf16, #tpu.memory_space<vmem>>, vector<256x128xbf16>
      tpu.vector_store %arg6[%c0_15, %c0_16], %18 {strides = array<i32>} : memref<256x128xbf16, #tpu.memory_space<vmem>>, vector<256x128xbf16>,
    } else {
    }
    return
  }
  func.func @transform_0(%arg0: i32, %arg1: i32, %arg2: i32) -> (i32, i32) {
    %c0_i32 = arith.constant 0 : i32
    return %arg0, %arg2 : i32, i32
  }
  func.func @transform_1(%arg0: i32, %arg1: i32, %arg2: i32) -> (i32, i32) {
    %c0_i32 = arith.constant 0 : i32
    return %arg2, %arg1 : i32, i32
  }
  func.func @transform_2(%arg0: i32, %arg1: i32, %arg2: i32) -> (i32, i32) {
    %c0_i32 = arith.constant 0 : i32
    %c0_i32_0 = arith.constant 0 : i32
    return %c0_i32, %arg1 : i32, i32
  }
  func.func @transform_3(%arg0: i32, %arg1: i32, %arg2: i32) -> (i32, i32) {
    %c0_i32 = arith.constant 0 : i32
    return %arg0, %arg1 : i32, i32
  }
}

</mosaic_0001>

<bundles_post_ra>
// kernel: fwd.7
= control target key start
LH: loop header
LB: loop body
LE: loop exit
PB: predicated region body
PF: predicated region fallthrough
CT: control target
= control target key end

     0   :  { %s1209_s12 = smov 0   ;;  %s1211_s13 = smov 0   ;;  %s1323_s0 = inlined_call_operand.vmem [shape: bf16[512,16], index: 0, kind: input, shape index: {}]   ;;  %s1324_s1 = inlined_call_operand.vmem [shape: bf16[16,128], index: 1, kind: input, shape index: {}]   ;;  %s1325_s2 = inlined_call_operand.vmem [shape: f32[1,128], index: 2, kind: input, shape index: {}]   ;;  %s1326_s3 = inlined_call_operand.vmem [shape: bf16[512,128], index: 3, kind: output, shape index: {}]  }
   0x1   :  { %s1213_s14 = smov 0  }
   0x2 LB: > { %s32_s15 = sadd.s32 1, %s1183_s13  ;;  %p934_p0 = scmp.ge.s32.totalorder %s1187_s14, 1  ;;  %s1187_s14 = sphi %s1213_s14, %s13_s14   ;;  %s1183_s13 = sphi %s1211_s13, %s1328_s13   ;;  %s1179_s12 = sphi %s1209_s12, %s1327_s12  }
   0x3   : > { %p34_p1 = scmp.ge.s32.totalorder %s32_s15, 2  ;;  %p188_p2 = scmp.lt.s32.totalorder %s1187_s14, 3 }
   0x5   : > { %s1330_s15 = smov (%p34_p1, %s32_s15), 0  ;;  %p189_p3 = pnand %p934_p0, %p188_p2 }
   0x6   : > { %s935_s18 = sshll.u32 (!%p189_p3), %s1179_s12, 5 }
   0x7   : > { %192 = sbr.rel (%p189_p3) target bundleno = 214 (0xd6), region = 32  ;;  %p230_p4 = scmp.lt.s32.totalorder (!%p189_p3), %s935_s18, 63 }
   0xc   : > { %v1041_v0 = vld [vmem:[%s1324_s1] sm:$0xff]  ;;  %s1332_s18 = smov (!%p230_p4, %s935_s18), 63  ;;  %vm448_vm0 = vcmask 130048  }
   0xd   : > { %504 = vmatpush.bf16.msra.mxu0 %v1041_v0  ;;  %1137 = vmatpush.bf16.msra.mxu1 %v1041_v0  ;;  %s936_s19 = sshll.u32 %s1332_s18, 2  ;;  %v1257_v19 = vld [vmem:[%s1325_s2] ss:$0 sm:$0xff] }
   0xe   : > { %1138 = vmatpush.bf16.msra.mxu2 %v1041_v0  ;;  %1139 = vmatpush.bf16.msra.mxu3 %v1041_v0  ;;  %s236_s22 = scalar_lea.vmem %s1323_s0, %s936_s19  ;;  %s1268_s27 = scalar_lea.vmem %s1326_s3, %s936_s19 }
   0xf   : > { %v1025_v1 = vld [vmem:[%s236_s22] sm:$0xff]  ;;  %v1026_v5 = vld [vmem:[%s236_s22 + $0x8] sm:$0xff]  ;;  %v1027_v9 = vld [vmem:[%s236_s22 + $0x10] sm:$0xff] }
  0x10   : > { %v1029_v2 = vld [vmem:[%s236_s22 + $0x20] sm:$0xff]  ;;  %1007 = vmatmul.msk.bf16.vlgmr.msra.gmra.mxu0 %vm448_vm0, %v1025_v1  ;;  %v1030_v6 = vld [vmem:[%s236_s22 + $0x28] sm:$0xff]  ;;  %v1031_v10 = vld [vmem:[%s236_s22 + $0x30] sm:$0xff] }
  0x11   : > { %v1033_v3 = vld [vmem:[%s236_s22 + $0x40] sm:$0xff]  ;;  %1011 = vmatmul.msk.bf16.vlgmr.msra.gmra.mxu1 %vm448_vm0, %v1029_v2  ;;  %v1034_v7 = vld [vmem:[%s236_s22 + $0x48] sm:$0xff]  ;;  %v1035_v11 = vld [vmem:[%s236_s22 + $0x50] sm:$0xff] }
  0x12   : > { %v1037_v4 = vld [vmem:[%s236_s22 + $0x60] sm:$0xff]  ;;  %1015 = vmatmul.msk.bf16.vlgmr.msra.gmra.mxu2 %vm448_vm0, %v1033_v3  ;;  %v1038_v8 = vld [vmem:[%s236_s22 + $0x68] sm:$0xff]  ;;  %v1039_v12 = vld [vmem:[%s236_s22 + $0x70] sm:$0xff] }
  0x13   : > { %1019 = vmatmul.msk.bf16.vlgmr.msra.gmra.mxu3 %vm448_vm0, %v1037_v4  ;;  %v1028_v13 = vld [vmem:[%s236_s22 + $0x18] sm:$0xff] }
  0x14   : > { %v1032_v14 = vld [vmem:[%s236_s22 + $0x38] sm:$0xff] }
  0x15   : > { %v1036_v15 = vld [vmem:[%s236_s22 + $0x58] sm:$0xff] }
  0x16   : > { %v1040_v16 = vld [vmem:[%s236_s22 + $0x78] sm:$0xff] }
  0x20   : > { %1008 = vmatmul.msk.bf16.gmra.mxu0 %vm448_vm0, %v1026_v5 }
  0x21   : > { %1012 = vmatmul.msk.bf16.gmra.mxu1 %vm448_vm0, %v1030_v6 }
  0x22   : > { %1016 = vmatmul.msk.bf16.gmra.mxu2 %vm448_vm0, %v1034_v7 }
  0x23   : > { %1020 = vmatmul.msk.bf16.gmra.mxu3 %vm448_vm0, %v1038_v8 }
  0x30   : > { %1009 = vmatmul.msk.bf16.gmra.mxu0 %vm448_vm0, %v1027_v9 }
  0x31   : > { %1013 = vmatmul.msk.bf16.gmra.mxu1 %vm448_vm0, %v1031_v10 }
  0x32   : > { %1017 = vmatmul.msk.bf16.gmra.mxu2 %vm448_vm0, %v1035_v11 }
  0x33   : > { %1021 = vmatmul.msk.bf16.gmra.mxu3 %vm448_vm0, %v1039_v12 }
  0x40   : > { %1010 = vmatmul.msk.bf16.gmra.mxu0 %vm448_vm0, %v1028_v13 }
  0x41   : > { %1014 = vmatmul.msk.bf16.gmra.mxu1 %vm448_vm0, %v1032_v14 }
  0x42   : > { %1018 = vmatmul.msk.bf16.gmra.mxu2 %vm448_vm0, %v1036_v15 }
  0x43   : > { %1022 = vmatmul.msk.bf16.gmra.mxu3 %vm448_vm0, %v1040_v16 }
  0x8d   : > { %v506_v17 = vpop.f32.mrf.mxu0 }
  0x8e   : > { %v526_v18 = vpop.f32.mrf.mxu1  ;;  %v689_v20 = vadd.f32 %v1257_v19, %v506_v17 }
  0x8f   : > { %v697_v21 = vadd.f32 %v1257_v19, %v526_v18 }
  0x90   : > { %v721_v28 = vmax.f32 %v689_v20, 0.0 }
  0x91   : > { %v729_v29 = vmax.f32 %v697_v21, 0.0 }
  0x95   : > { %v546_v22 = vpop.f32.mrf.mxu2  ;;  %v508_v24 = vpop.f32.mrf.mxu0 }
  0x96   : > { %v566_v23 = vpop.f32.mrf.mxu3  ;;  %v528_v25 = vpop.f32.mrf.mxu1  ;;  %v690_v26 = vadd.f32 %v1257_v19, %v508_v24  ;;  %v705_v34 = vadd.f32 %v1257_v19, %v546_v22 }
  0x97   : > { %v698_v27 = vadd.f32 %v1257_v19, %v528_v25  ;;  %v713_v35 = vadd.f32 %v1257_v19, %v566_v23 }
  0x98   : > { %v722_v30 = vmax.f32 %v690_v26, 0.0  ;;  %v737_v42 = vmax.f32 %v705_v34, 0.0 }
  0x99   : > { %v730_v31 = vmax.f32 %v698_v27, 0.0  ;;  %v745_v43 = vmax.f32 %v713_v35, 0.0 }
  0x9a   : > { %v1045_v32 = vpack.c.bf16 %v722_v30, %v721_v28 }
  0x9b   : > { %v1065_v33 = vpack.c.bf16 %v730_v31, %v729_v29 }
  0x9c   : > { %1046 = vst [vmem:[%s1268_s27] sm:$0xff] %v1045_v32  }
  0x9d   : > { %v548_v36 = vpop.f32.mrf.mxu2  ;;  %1125 = vst [vmem:[%s1268_s27 + $0x20] sm:$0xff] %v1065_v33   ;;  %v511_v40 = vpop.f32.mrf.mxu0 }
  0x9e   : > { %v568_v37 = vpop.f32.mrf.mxu3  ;;  %v706_v38 = vadd.f32 %v1257_v19, %v548_v36  ;;  %v531_v41 = vpop.f32.mrf.mxu1  ;;  %v691_v48 = vadd.f32 %v1257_v19, %v511_v40 }
  0x9f   : > { %v714_v39 = vadd.f32 %v1257_v19, %v568_v37  ;;  %v699_v49 = vadd.f32 %v1257_v19, %v531_v41 }
  0xa0   : > { %v738_v44 = vmax.f32 %v706_v38, 0.0  ;;  %v723_v56 = vmax.f32 %v691_v48, 0.0 }
  0xa1   : > { %v746_v45 = vmax.f32 %v714_v39, 0.0  ;;  %v731_v57 = vmax.f32 %v699_v49, 0.0 }
  0xa2   : > { %v1085_v46 = vpack.c.bf16 %v738_v44, %v737_v42 }
  0xa3   : > { %v1105_v47 = vpack.c.bf16 %v746_v45, %v745_v43 }
  0xa4   : > { %1129 = vst [vmem:[%s1268_s27 + $0x40] sm:$0xff] %v1085_v46  }
  0xa5   : > { %1133 = vst [vmem:[%s1268_s27 + $0x60] sm:$0xff] %v1105_v47   ;;  %v551_v50 = vpop.f32.mrf.mxu2  ;;  %v513_v52 = vpop.f32.mrf.mxu0 }
  0xa6   : > { %v571_v51 = vpop.f32.mrf.mxu3  ;;  %v533_v53 = vpop.f32.mrf.mxu1  ;;  %v692_v54 = vadd.f32 %v1257_v19, %v513_v52  ;;  %v707_v62 = vadd.f32 %v1257_v19, %v551_v50 }
  0xa7   : > { %v700_v55 = vadd.f32 %v1257_v19, %v533_v53  ;;  %v715_v63 = vadd.f32 %v1257_v19, %v571_v51 }
  0xa8   : > { %v724_v58 = vmax.f32 %v692_v54, 0.0  ;;  %v739_v6 = vmax.f32 %v707_v62, 0.0 }
  0xa9   : > { %v732_v59 = vmax.f32 %v700_v55, 0.0  ;;  %v747_v7 = vmax.f32 %v715_v63, 0.0 }
  0xaa   : > { %v1050_v60 = vpack.c.bf16 %v724_v58, %v723_v56 }
  0xab   : > { %v1070_v61 = vpack.c.bf16 %v732_v59, %v731_v57 }
  0xac   : > { %1122 = vst [vmem:[%s1268_s27 + $0x8] sm:$0xff] %v1050_v60  }
  0xad   : > { %v553_v0 = vpop.f32.mrf.mxu2  ;;  %1126 = vst [vmem:[%s1268_s27 + $0x28] sm:$0xff] %v1070_v61   ;;  %v516_v4 = vpop.f32.mrf.mxu0 }
  0xae   : > { %v573_v1 = vpop.f32.mrf.mxu3  ;;  %v708_v2 = vadd.f32 %v1257_v19, %v553_v0  ;;  %v536_v5 = vpop.f32.mrf.mxu1  ;;  %v693_v12 = vadd.f32 %v1257_v19, %v516_v4 }
  0xaf   : > { %v716_v3 = vadd.f32 %v1257_v19, %v573_v1  ;;  %v701_v13 = vadd.f32 %v1257_v19, %v536_v5 }
  0xb0   : > { %v740_v8 = vmax.f32 %v708_v2, 0.0  ;;  %v725_v21 = vmax.f32 %v693_v12, 0.0 }
  0xb1   : > { %v748_v9 = vmax.f32 %v716_v3, 0.0  ;;  %v733_v22 = vmax.f32 %v701_v13, 0.0 }
  0xb2   : > { %v1090_v10 = vpack.c.bf16 %v740_v8, %v739_v6 }
  0xb3   : > { %v1110_v11 = vpack.c.bf16 %v748_v9, %v747_v7 }
  0xb4   : > { %1130 = vst [vmem:[%s1268_s27 + $0x48] sm:$0xff] %v1090_v10  }
  0xb5   : > { %1134 = vst [vmem:[%s1268_s27 + $0x68] sm:$0xff] %v1110_v11   ;;  %v556_v14 = vpop.f32.mrf.mxu2  ;;  %v518_v16 = vpop.f32.mrf.mxu0 }
  0xb6   : > { %v576_v15 = vpop.f32.mrf.mxu3  ;;  %v538_v17 = vpop.f32.mrf.mxu1  ;;  %v694_v18 = vadd.f32 %v1257_v19, %v518_v16  ;;  %v709_v27 = vadd.f32 %v1257_v19, %v556_v14 }
  0xb7   : > { %v702_v20 = vadd.f32 %v1257_v19, %v538_v17  ;;  %v717_v28 = vadd.f32 %v1257_v19, %v576_v15 }
  0xb8   : > { %v726_v23 = vmax.f32 %v694_v18, 0.0  ;;  %v741_v35 = vmax.f32 %v709_v27, 0.0 }
  0xb9   : > { %v734_v24 = vmax.f32 %v702_v20, 0.0  ;;  %v749_v36 = vmax.f32 %v717_v28, 0.0 }
  0xba   : > { %v1055_v25 = vpack.c.bf16 %v726_v23, %v725_v21 }
  0xbb   : > { %v1075_v26 = vpack.c.bf16 %v734_v24, %v733_v22 }
  0xbc   : > { %1123 = vst [vmem:[%s1268_s27 + $0x10] sm:$0xff] %v1055_v25  }
  0xbd   : > { %v558_v29 = vpop.f32.mrf.mxu2  ;;  %1127 = vst [vmem:[%s1268_s27 + $0x30] sm:$0xff] %v1075_v26   ;;  %v521_v33 = vpop.f32.mrf.mxu0 }
  0xbe   : > { %v578_v30 = vpop.f32.mrf.mxu3  ;;  %v710_v31 = vadd.f32 %v1257_v19, %v558_v29  ;;  %v541_v34 = vpop.f32.mrf.mxu1  ;;  %v695_v41 = vadd.f32 %v1257_v19, %v521_v33 }
  0xbf   : > { %v718_v32 = vadd.f32 %v1257_v19, %v578_v30  ;;  %v703_v42 = vadd.f32 %v1257_v19, %v541_v34 }
  0xc0   : > { %v742_v37 = vmax.f32 %v710_v31, 0.0  ;;  %v727_v49 = vmax.f32 %v695_v41, 0.0 }
  0xc1   : > { %v750_v38 = vmax.f32 %v718_v32, 0.0  ;;  %v735_v50 = vmax.f32 %v703_v42, 0.0 }
  0xc2   : > { %v1095_v39 = vpack.c.bf16 %v742_v37, %v741_v35 }
  0xc3   : > { %v1115_v40 = vpack.c.bf16 %v750_v38, %v749_v36 }
  0xc4   : > { %1131 = vst [vmem:[%s1268_s27 + $0x50] sm:$0xff] %v1095_v39  }
  0xc5   : > { %1135 = vst [vmem:[%s1268_s27 + $0x70] sm:$0xff] %v1115_v40   ;;  %v561_v43 = vpop.f32.mrf.mxu2  ;;  %v523_v45 = vpop.f32.mrf.mxu0 }
  0xc6   : > { %v581_v44 = vpop.f32.mrf.mxu3  ;;  %v543_v46 = vpop.f32.mrf.mxu1  ;;  %v696_v47 = vadd.f32 %v1257_v19, %v523_v45  ;;  %v711_v55 = vadd.f32 %v1257_v19, %v561_v43 }
  0xc7   : > { %v704_v48 = vadd.f32 %v1257_v19, %v543_v46  ;;  %v719_v56 = vadd.f32 %v1257_v19, %v581_v44 }
  0xc8   : > { %v728_v51 = vmax.f32 %v696_v47, 0.0  ;;  %v743_v61 = vmax.f32 %v711_v55, 0.0 }
  0xc9   : > { %v736_v52 = vmax.f32 %v704_v48, 0.0  ;;  %v751_v62 = vmax.f32 %v719_v56, 0.0 }
  0xca   : > { %v1060_v53 = vpack.c.bf16 %v728_v51, %v727_v49 }
  0xcb   : > { %v1080_v54 = vpack.c.bf16 %v736_v52, %v735_v50 }
  0xcc   : > { %1124 = vst [vmem:[%s1268_s27 + $0x18] sm:$0xff] %v1060_v53  }
  0xcd   : > { %v563_v57 = vpop.f32.mrf.mxu2  ;;  %1128 = vst [vmem:[%s1268_s27 + $0x38] sm:$0xff] %v1080_v54  }
  0xce   : > { %v583_v58 = vpop.f32.mrf.mxu3  ;;  %v712_v59 = vadd.f32 %v1257_v19, %v563_v57 }
  0xcf   : > { %v720_v60 = vadd.f32 %v1257_v19, %v583_v58 }
  0xd0   : > { %v744_v63 = vmax.f32 %v712_v59, 0.0 }
  0xd1   : > { %v752_v0 = vmax.f32 %v720_v60, 0.0 }
  0xd2   : > { %v1100_v1 = vpack.c.bf16 %v744_v63, %v743_v61 }
  0xd3   : > { %v1120_v2 = vpack.c.bf16 %v752_v0, %v751_v62 }
  0xd4   : > { %1132 = vst [vmem:[%s1268_s27 + $0x58] sm:$0xff] %v1100_v1  }
  0xd5   : > { %1136 = vst [vmem:[%s1268_s27 + $0x78] sm:$0xff] %v1120_v2  }
  0xd6 PF: > { %s13_s14 = sadd.s32 1, %s1187_s14   ;;  %s1327_s12 = smov %s1183_s13 }
  0xd7   : > { %p10_p5 = scmp.ge.s32.totalorder %s13_s14, 4   ;;  %s1328_s13 = smov %s1330_s15 }
  0xd9   :  { %12 = sbr.rel (!%p10_p5) target bundleno = 2 (0x2), region = 76 }

// kernel: fwd.6
= control target key start
LH: loop header
LB: loop body
LE: loop exit
PB: predicated region body
PF: predicated region fallthrough
CT: control target
= control target key end

     0   :  { %s1616_s12 = smov 0   ;;  %s1618_s13 = smov 0   ;;  %s1835_s0 = inlined_call_operand.vmem [shape: bf16[512,200], index: 0, kind: input, shape index: {}]   ;;  %s1836_s1 = inlined_call_operand.vmem [shape: bf16[200,128], index: 1, kind: input, shape index: {}]   ;;  %s1837_s2 = inlined_call_operand.vmem [shape: f32[1,128], index: 2, kind: input, shape index: {}]   ;;  %s1838_s3 = inlined_call_operand.vmem [shape: bf16[512,128], index: 3, kind: output, shape index: {}]  }
   0x1   :  { %s1620_s14 = smov 0  }
   0x2 LB: > { %s32_s15 = sadd.s32 1, %s1590_s13  ;;  %p1194_p0 = scmp.ge.s32.totalorder %s1594_s14, 1  ;;  %s1594_s14 = sphi %s1620_s14, %s13_s14   ;;  %s1590_s13 = sphi %s1618_s13, %s1840_s13   ;;  %s1586_s12 = sphi %s1616_s12, %s1839_s12  }
   0x3   : > { %p34_p1 = scmp.ge.s32.totalorder %s32_s15, 2  ;;  %p191_p2 = scmp.lt.s32.totalorder %s1594_s14, 3 }
   0x5   : > { %s1842_s15 = smov (%p34_p1, %s32_s15), 0  ;;  %p192_p3 = pnand %p1194_p0, %p191_p2 }
   0x6   : > { %s1195_s20 = sshll.u32 (!%p192_p3), %s1586_s12, 5 }
   0x7   : > { %195 = sbr.rel (%p192_p3) target bundleno = 308 (0x134), region = 32  ;;  %p236_p4 = scmp.lt.s32.totalorder (!%p192_p3), %s1195_s20, 63 }
   0xc   : > { %v1434_v0 = vld [vmem:[%s1836_s1 + $0x38] sm:$0xff]  ;;  %v392_v1 = vld [vmem:[%s1836_s1 + $0x60] sm:$0xf]  ;;  %vm661_vm0 = vcmask 1043456   ;;  %v1433_v3 = vld [vmem:[%s1836_s1 + $0x30] sm:$0xff]  ;;  %s1844_s20 = smov (!%p236_p4, %s1195_s20), 63 }
   0xd   : > { %v586_v2 = vunpack.c.l.b16 %v392_v1  ;;  %665 = vmatpush.bf16.msra.mxu0 %v1434_v0  ;;  %1534 = vmatpush.bf16.msra.mxu2 %v1434_v0  ;;  %v1438_v6 = vld [vmem:[%s1836_s1 + $0x58] sm:$0xff]  ;;  %v1432_v7 = vld [vmem:[%s1836_s1 + $0x28] sm:$0xff]  ;;  %v1437_v8 = vld [vmem:[%s1836_s1 + $0x50] sm:$0xff]  ;;  %s1394_s4 = sshll.u32 %s1844_s20, 3  ;;  %vm612_vm1 = vcmask 588800   ;;  %s1199_s26 = sshll.u32 %s1844_s20, 2 }
   0xe   : > { %v1431_v9 = vld [vmem:[%s1836_s1 + $0x20] sm:$0xff]  ;;  %v1436_v10 = vld [vmem:[%s1836_s1 + $0x48] sm:$0xff]  ;;  %v1430_v11 = vld [vmem:[%s1836_s1 + $0x18] sm:$0xff]  ;;  %s1667_s11 = scalar_lea.vmem %s1835_s0, %s1394_s4  ;;  %s1774_s29 = scalar_lea.vmem %s1838_s3, %s1199_s26 }
   0xf   : > { %v599_v4 = vpack.c.b16 %v586_v2, %v586_v2  ;;  %v1435_v12 = vld [vmem:[%s1836_s1 + $0x40] sm:$0xff]  ;;  %v1429_v13 = vld [vmem:[%s1836_s1 + $0x10] sm:$0xff]  ;;  %v1204_v15 = vld [vmem:[%s1667_s11 + $0x8] sm:$0xf0] }
  0x10   : > { %v1395_v14 = vld [vmem:[%s1667_s11 + $0x4] sm:$0xf]  ;;  %v1413_v16 = vld [vmem:[%s1667_s11 + $0x94] sm:$0xf]  ;;  %v1276_v17 = vld [vmem:[%s1667_s11 + $0x98] sm:$0xf0] }
  0x11   : > { %v663_v5 = vsel %vm661_vm0, %v599_v4, 0  ;;  %666 = vmatpush.bf16.msra.mxu0 %v1433_v3  ;;  %1535 = vmatpush.bf16.msra.mxu2 %v1433_v3  ;;  %v1207_v18 = vor.u32 %v1395_v14, %v1204_v15  ;;  %v1428_v19 = vld [vmem:[%s1836_s1 + $0x8] sm:$0xff]  ;;  %v1279_v20 = vor.u32 %v1413_v16, %v1276_v17  ;;  %v1427_v21 = vld [vmem:[%s1836_s1] sm:$0xff]  ;;  %v1397_v28 = vld [vmem:[%s1667_s11 + $0x14] sm:$0xf] }
  0x12   : > { %757 = vmatpush.bf16.msra.mxu1 %v663_v5  ;;  %1542 = vmatpush.bf16.msra.mxu3 %v663_v5  ;;  %v1202_v22 = vld [vmem:[%s1667_s11] sm:$0xf]  ;;  %v1396_v23 = vld [vmem:[%s1667_s11 + $0x4] sm:$0xf0]  ;;  %v1212_v29 = vld [vmem:[%s1667_s11 + $0x18] sm:$0xf0] }
  0x13   : > { %v1266_v24 = vld [vmem:[%s1667_s11 + $0x80] sm:$0xf]  ;;  %v1412_v25 = vld [vmem:[%s1667_s11 + $0x84] sm:$0xf0]  ;;  %v1203_v26 = vor.u32 %v1396_v23, %v1202_v22  ;;  %v1415_v30 = vld [vmem:[%s1667_s11 + $0xa4] sm:$0xf]  ;;  %v1215_v32 = vor.u32 %v1397_v28, %v1212_v29 }
  0x14   : > { %v1267_v27 = vor.u32 %v1412_v25, %v1266_v24  ;;  %v1284_v31 = vld [vmem:[%s1667_s11 + $0xa8] sm:$0xf0]  ;;  %v1210_v34 = vld [vmem:[%s1667_s11 + $0x10] sm:$0xf]  ;;  %v1398_v35 = vld [vmem:[%s1667_s11 + $0x14] sm:$0xf0] }
  0x15   : > { %667 = vmatpush.bf16.msra.mxu0 %v1432_v7  ;;  %1536 = vmatpush.bf16.msra.mxu2 %v1432_v7  ;;  %v1287_v33 = vor.u32 %v1415_v30, %v1284_v31  ;;  %v1274_v36 = vld [vmem:[%s1667_s11 + $0x90] sm:$0xf]  ;;  %v1414_v37 = vld [vmem:[%s1667_s11 + $0x94] sm:$0xf0]  ;;  %v1211_v38 = vor.u32 %v1398_v35, %v1210_v34  ;;  %v1399_v40 = vld [vmem:[%s1667_s11 + $0x24] sm:$0xf] }
  0x16   : > { %758 = vmatpush.bf16.msra.mxu1 %v1438_v6  ;;  %1543 = vmatpush.bf16.msra.mxu3 %v1438_v6  ;;  %v1275_v39 = vor.u32 %v1414_v37, %v1274_v36  ;;  %v1220_v41 = vld [vmem:[%s1667_s11 + $0x28] sm:$0xf0]  ;;  %v1417_v42 = vld [vmem:[%s1667_s11 + $0xb4] sm:$0xf]  ;;  %v1292_v43 = vld [vmem:[%s1667_s11 + $0xb8] sm:$0xf0] }
  0x17   : > { %v1223_v44 = vor.u32 %v1399_v40, %v1220_v41  ;;  %v1295_v45 = vor.u32 %v1417_v42, %v1292_v43  ;;  %v1218_v46 = vld [vmem:[%s1667_s11 + $0x20] sm:$0xf]  ;;  %v1400_v47 = vld [vmem:[%s1667_s11 + $0x24] sm:$0xf0]  ;;  %v1401_v52 = vld [vmem:[%s1667_s11 + $0x34] sm:$0xf] }
  0x18   : > { %v1282_v48 = vld [vmem:[%s1667_s11 + $0xa0] sm:$0xf]  ;;  %v1416_v49 = vld [vmem:[%s1667_s11 + $0xa4] sm:$0xf0]  ;;  %v1219_v50 = vor.u32 %v1400_v47, %v1218_v46  ;;  %v1228_v53 = vld [vmem:[%s1667_s11 + $0x38] sm:$0xf0] }
  0x19   : > { %668 = vmatpush.bf16.msra.mxu0 %v1431_v9  ;;  %1537 = vmatpush.bf16.msra.mxu2 %v1431_v9  ;;  %v1283_v51 = vor.u32 %v1416_v49, %v1282_v48  ;;  %v1419_v54 = vld [vmem:[%s1667_s11 + $0xc4] sm:$0xf]  ;;  %v1300_v55 = vld [vmem:[%s1667_s11 + $0xc8] sm:$0xf0]  ;;  %v1231_v56 = vor.u32 %v1401_v52, %v1228_v53  ;;  %v1226_v58 = vld [vmem:[%s1667_s11 + $0x30] sm:$0xf] }
  0x1a   : > { %759 = vmatpush.bf16.msra.mxu1 %v1437_v8  ;;  %1544 = vmatpush.bf16.msra.mxu3 %v1437_v8  ;;  %v1303_v57 = vor.u32 %v1419_v54, %v1300_v55  ;;  %v1402_v59 = vld [vmem:[%s1667_s11 + $0x34] sm:$0xf0]  ;;  %v1290_v60 = vld [vmem:[%s1667_s11 + $0xb0] sm:$0xf]  ;;  %v1403_v0 = vld [vmem:[%s1667_s11 + $0x44] sm:$0xf] }
  0x1b   : > { %v1418_v61 = vld [vmem:[%s1667_s11 + $0xb4] sm:$0xf0]  ;;  %v1227_v62 = vor.u32 %v1402_v59, %v1226_v58  ;;  %v1236_v1 = vld [vmem:[%s1667_s11 + $0x48] sm:$0xf0]  ;;  %v1421_v2 = vld [vmem:[%s1667_s11 + $0xd4] sm:$0xf] }
  0x1c   : > { %v1291_v63 = vor.u32 %v1418_v61, %v1290_v60  ;;  %v1308_v3 = vld [vmem:[%s1667_s11 + $0xd8] sm:$0xf0]  ;;  %v1239_v4 = vor.u32 %v1403_v0, %v1236_v1  ;;  %v1234_v6 = vld [vmem:[%s1667_s11 + $0x40] sm:$0xf]  ;;  %v1404_v7 = vld [vmem:[%s1667_s11 + $0x44] sm:$0xf0] }
  0x1d   : > { %669 = vmatpush.bf16.msra.mxu0 %v1430_v11  ;;  %1538 = vmatpush.bf16.msra.mxu2 %v1430_v11  ;;  %v1311_v5 = vor.u32 %v1421_v2, %v1308_v3  ;;  %v1298_v8 = vld [vmem:[%s1667_s11 + $0xc0] sm:$0xf]  ;;  %v1420_v9 = vld [vmem:[%s1667_s11 + $0xc4] sm:$0xf0]  ;;  %v1423_v14 = vld [vmem:[%s1667_s11 + $0xe4] sm:$0xf] }
  0x1e   : > { %760 = vmatpush.bf16.msra.mxu1 %v1436_v10  ;;  %1545 = vmatpush.bf16.msra.mxu3 %v1436_v10  ;;  %v1235_v10 = vor.u32 %v1404_v7, %v1234_v6  ;;  %v1299_v11 = vor.u32 %v1420_v9, %v1298_v8  ;;  %v1316_v15 = vld [vmem:[%s1667_s11 + $0xe8] sm:$0xf0]  ;;  %v1407_v24 = vld [vmem:[%s1667_s11 + $0x64] sm:$0xf]  ;;  %v1250_v30 = vld [vmem:[%s1667_s11 + $0x60] sm:$0xf] }
  0x1f   : > { %v1319_v17 = vor.u32 %v1423_v14, %v1316_v15  ;;  %v1252_v25 = vld [vmem:[%s1667_s11 + $0x68] sm:$0xf0]  ;;  %v1408_v31 = vld [vmem:[%s1667_s11 + $0x64] sm:$0xf0]  ;;  %v1409_v36 = vld [vmem:[%s1667_s11 + $0x74] sm:$0xf] }
  0x20   : > { %v1255_v28 = vor.u32 %v1407_v24, %v1252_v25  ;;  %v1251_v34 = vor.u32 %v1408_v31, %v1250_v30  ;;  %v1260_v37 = vld [vmem:[%s1667_s11 + $0x78] sm:$0xf0]  ;;  %v1410_v40 = vld [vmem:[%s1667_s11 + $0x74] sm:$0xf0]  ;;  %v1322_v41 = vld [vmem:[%s1667_s11 + $0xf0] sm:$0xf] }
  0x21   : > { %670 = vmatpush.bf16.msra.mxu0 %v1429_v13  ;;  %1539 = vmatpush.bf16.msra.mxu2 %v1429_v13  ;;  %v1244_v13 = vld [vmem:[%s1667_s11 + $0x58] sm:$0xf0]  ;;  %v1426_v42 = vld [vmem:[%s1667_s11 + $0xf4] sm:$0xf0]  ;;  %v1268_v46 = vld [vmem:[%s1667_s11 + $0x88] sm:$0xf0] }
  0x22   : > { %761 = vmatpush.bf16.msra.mxu1 %v1435_v12  ;;  %1546 = vmatpush.bf16.msra.mxu3 %v1435_v12  ;;  %v1405_v12 = vld [vmem:[%s1667_s11 + $0x54] sm:$0xf]  ;;  %v1764_v53 = vld [vmem:[%s1837_s2] ss:$0 sm:$0xff] }
  0x23   : > { %v1247_v16 = vor.u32 %v1405_v12, %v1244_v13 }
  0x25   : > { %1376 = vmatmul.msk.bf16.vlgmr.msra.gmra.mxu1 %vm612_vm1, %v1207_v18  ;;  %671 = vmatpush.bf16.msra.mxu0 %v1428_v19  ;;  %v1242_v18 = vld [vmem:[%s1667_s11 + $0x50] sm:$0xf] }
  0x26   : > { %1385 = vmatmul.msk.bf16.vlgmr.msra.gmra.mxu3 %vm612_vm1, %v1279_v20  ;;  %1540 = vmatpush.bf16.msra.mxu2 %v1428_v19  ;;  %v1406_v19 = vld [vmem:[%s1667_s11 + $0x54] sm:$0xf0]  ;;  %v1306_v20 = vld [vmem:[%s1667_s11 + $0xd0] sm:$0xf] }
  0x27   : > { %v1243_v22 = vor.u32 %v1406_v19, %v1242_v18 }
  0x29   : > { %672 = vmatpush.bf16.msra.mxu0 %v1427_v21 }
  0x2a   : > { %1541 = vmatpush.bf16.msra.mxu2 %v1427_v21  ;;  %v1422_v21 = vld [vmem:[%s1667_s11 + $0xd4] sm:$0xf0] }
  0x2b   : > { %v1307_v23 = vor.u32 %v1422_v21, %v1306_v20 }
  0x2c   : > { %673 = vmatmul.bf16.vlgmr.msra.gmra.mxu0 %v1203_v26  ;;  %v1425_v26 = vld [vmem:[%s1667_s11 + $0xf4] sm:$0xf] }
  0x2d   : > { %713 = vmatmul.bf16.vlgmr.msra.gmra.mxu2 %v1267_v27  ;;  %v1324_v27 = vld [vmem:[%s1667_s11 + $0xf8] sm:$0xf0] }
  0x2e   : > { %v1327_v29 = vor.u32 %v1425_v26, %v1324_v27 }
  0x35   : > { %1377 = vmatmul.msk.bf16.gmra.mxu1 %vm612_vm1, %v1215_v32  ;;  %v1314_v32 = vld [vmem:[%s1667_s11 + $0xe0] sm:$0xf] }
  0x36   : > { %1386 = vmatmul.msk.bf16.gmra.mxu3 %vm612_vm1, %v1287_v33  ;;  %v1424_v33 = vld [vmem:[%s1667_s11 + $0xe4] sm:$0xf0] }
  0x37   : > { %v1315_v35 = vor.u32 %v1424_v33, %v1314_v32 }
  0x3c   : > { %678 = vmatmul.bf16.gmra.mxu0 %v1211_v38  ;;  %v1263_v38 = vor.u32 %v1409_v36, %v1260_v37 }
  0x3d   : > { %718 = vmatmul.bf16.gmra.mxu2 %v1275_v39  ;;  %v1258_v39 = vld [vmem:[%s1667_s11 + $0x70] sm:$0xf] }
  0x3e   : > { %v1259_v43 = vor.u32 %v1410_v40, %v1258_v39 }
  0x45   : > { %1378 = vmatmul.msk.bf16.gmra.mxu1 %vm612_vm1, %v1223_v44  ;;  %v1323_v44 = vor.u32 %v1426_v42, %v1322_v41 }
  0x46   : > { %1387 = vmatmul.msk.bf16.gmra.mxu3 %vm612_vm1, %v1295_v45  ;;  %v1411_v45 = vld [vmem:[%s1667_s11 + $0x84] sm:$0xf] }
  0x47   : > { %v1271_v47 = vor.u32 %v1411_v45, %v1268_v46 }
  0x4c   : > { %683 = vmatmul.bf16.gmra.mxu0 %v1219_v50 }
  0x4d   : > { %723 = vmatmul.bf16.gmra.mxu2 %v1283_v51 }
  0x55   : > { %1379 = vmatmul.msk.bf16.gmra.mxu1 %vm612_vm1, %v1231_v56 }
  0x56   : > { %1388 = vmatmul.msk.bf16.gmra.mxu3 %vm612_vm1, %v1303_v57 }
  0x5c   : > { %688 = vmatmul.bf16.gmra.mxu0 %v1227_v62 }
  0x5d   : > { %728 = vmatmul.bf16.gmra.mxu2 %v1291_v63 }
  0x65   : > { %1380 = vmatmul.msk.bf16.gmra.mxu1 %vm612_vm1, %v1239_v4 }
  0x66   : > { %1389 = vmatmul.msk.bf16.gmra.mxu3 %vm612_vm1, %v1311_v5 }
  0x6c   : > { %693 = vmatmul.bf16.gmra.mxu0 %v1235_v10 }
  0x6d   : > { %733 = vmatmul.bf16.gmra.mxu2 %v1299_v11 }
  0x75   : > { %1381 = vmatmul.msk.bf16.gmra.mxu1 %vm612_vm1, %v1247_v16 }
  0x76   : > { %1390 = vmatmul.msk.bf16.gmra.mxu3 %vm612_vm1, %v1319_v17 }
  0x7c   : > { %698 = vmatmul.bf16.gmra.mxu0 %v1243_v22 }
  0x7d   : > { %738 = vmatmul.bf16.gmra.mxu2 %v1307_v23 }
  0x85   : > { %1382 = vmatmul.msk.bf16.gmra.mxu1 %vm612_vm1, %v1255_v28 }
  0x86   : > { %1391 = vmatmul.msk.bf16.gmra.mxu3 %vm612_vm1, %v1327_v29 }
  0x8c   : > { %703 = vmatmul.bf16.gmra.mxu0 %v1251_v34 }
  0x8d   : > { %743 = vmatmul.bf16.gmra.mxu2 %v1315_v35 }
  0x95   : > { %1383 = vmatmul.msk.bf16.gmra.mxu1 %vm612_vm1, %v1263_v38 }
  0x9c   : > { %708 = vmatmul.bf16.gmra.mxu0 %v1259_v43 }
  0x9d   : > { %748 = vmatmul.bf16.gmra.mxu2 %v1323_v44 }
  0xa2   : > { %v763_v48 = vpop.f32.mrf.mxu1 }
  0xa5   : > { %1384 = vmatmul.msk.bf16.gmra.mxu1 %vm612_vm1, %v1271_v47 }
  0xa9   : > { %v808_v49 = vpop.f32.mrf.mxu3  ;;  %v674_v51 = vpop.f32.mrf.mxu0 }
  0xaa   : > { %v765_v50 = vpop.f32.mrf.mxu1  ;;  %v764_v52 = vadd.f32 %v763_v48, %v674_v51 }
  0xac   : > { %v946_v58 = vadd.f32 %v1764_v53, %v764_v52 }
  0xae   : > { %v978_v61 = vmax.f32 %v946_v58, 0.0 }
  0xb0   : > { %v1766_v54 = vpop.f32.mrf.mxu2 }
  0xb1   : > { %v810_v55 = vpop.f32.mrf.mxu3  ;;  %v676_v57 = vpop.f32.mrf.mxu0 }
  0xb2   : > { %v768_v56 = vpop.f32.mrf.mxu1  ;;  %v766_v59 = vadd.f32 %v765_v50, %v676_v57 }
  0xb4   : > { %v947_v60 = vadd.f32 %v1764_v53, %v766_v59 }
  0xb6   : > { %v979_v62 = vmax.f32 %v947_v60, 0.0 }
  0xb8   : > { %v1442_v63 = vpack.c.bf16 %v979_v62, %v978_v61  ;;  %v1776_v0 = vpop.f32.mrf.mxu2 }
  0xb9   : > { %v679_v2 = vpop.f32.mrf.mxu0  ;;  %v813_v3 = vpop.f32.mrf.mxu3 }
  0xba   : > { %v770_v1 = vpop.f32.mrf.mxu1  ;;  %1443 = vst [vmem:[%s1774_s29] sm:$0xff] %v1442_v63   ;;  %v769_v4 = vadd.f32 %v768_v56, %v679_v2 }
  0xbc   : > { %v948_v8 = vadd.f32 %v1764_v53, %v769_v4 }
  0xbe   : > { %v980_v13 = vmax.f32 %v948_v8, 0.0 }
  0xc0   : > { %v719_v5 = vpop.f32.mrf.mxu2 }
  0xc1   : > { %v681_v7 = vpop.f32.mrf.mxu0  ;;  %v815_v11 = vpop.f32.mrf.mxu3  ;;  %v809_v12 = vadd.f32 %v808_v49, %v719_v5 }
  0xc2   : > { %v773_v6 = vpop.f32.mrf.mxu1  ;;  %v771_v9 = vadd.f32 %v770_v1, %v681_v7 }
  0xc3   : > { %v964_v17 = vadd.f32 %v1764_v53, %v809_v12 }
  0xc4   : > { %v949_v10 = vadd.f32 %v1764_v53, %v771_v9 }
  0xc5   : > { %v996_v22 = vmax.f32 %v964_v17, 0.0 }
  0xc6   : > { %v981_v14 = vmax.f32 %v949_v10, 0.0 }
  0xc8   : > { %v1447_v15 = vpack.c.bf16 %v981_v14, %v980_v13  ;;  %v721_v16 = vpop.f32.mrf.mxu2 }
  0xc9   : > { %v811_v18 = vadd.f32 %v810_v55, %v721_v16  ;;  %v684_v20 = vpop.f32.mrf.mxu0  ;;  %v818_v25 = vpop.f32.mrf.mxu3 }
  0xca   : > { %v775_v19 = vpop.f32.mrf.mxu1  ;;  %1519 = vst [vmem:[%s1774_s29 + $0x8] sm:$0xff] %v1447_v15   ;;  %v774_v24 = vadd.f32 %v773_v6, %v684_v20 }
  0xcb   : > { %v965_v21 = vadd.f32 %v1764_v53, %v811_v18 }
  0xcc   : > { %v950_v30 = vadd.f32 %v1764_v53, %v774_v24 }
  0xcd   : > { %v997_v23 = vmax.f32 %v965_v21, 0.0 }
  0xce   : > { %v982_v34 = vmax.f32 %v950_v30, 0.0 }
  0xcf   : > { %v1487_v26 = vpack.c.bf16 %v997_v23, %v996_v22 }
  0xd0   : > { %v724_v27 = vpop.f32.mrf.mxu2 }
  0xd1   : > { %1527 = vst [vmem:[%s1774_s29 + $0x48] sm:$0xff] %v1487_v26   ;;  %v686_v29 = vpop.f32.mrf.mxu0  ;;  %v814_v33 = vadd.f32 %v813_v3, %v724_v27  ;;  %v820_v38 = vpop.f32.mrf.mxu3 }
  0xd2   : > { %v778_v28 = vpop.f32.mrf.mxu1  ;;  %v776_v31 = vadd.f32 %v775_v19, %v686_v29 }
  0xd3   : > { %v966_v39 = vadd.f32 %v1764_v53, %v814_v33 }
  0xd4   : > { %v951_v32 = vadd.f32 %v1764_v53, %v776_v31 }
  0xd5   : > { %v998_v44 = vmax.f32 %v966_v39, 0.0 }
  0xd6   : > { %v983_v35 = vmax.f32 %v951_v32, 0.0 }
  0xd8   : > { %v1452_v36 = vpack.c.bf16 %v983_v35, %v982_v34  ;;  %v726_v37 = vpop.f32.mrf.mxu2 }
  0xd9   : > { %v816_v40 = vadd.f32 %v815_v11, %v726_v37  ;;  %v689_v42 = vpop.f32.mrf.mxu0  ;;  %v823_v55 = vpop.f32.mrf.mxu3 }
  0xda   : > { %v780_v41 = vpop.f32.mrf.mxu1  ;;  %1520 = vst [vmem:[%s1774_s29 + $0x10] sm:$0xff] %v1452_v36   ;;  %v779_v46 = vadd.f32 %v778_v28, %v689_v42 }
  0xdb   : > { %v967_v43 = vadd.f32 %v1764_v53, %v816_v40 }
  0xdc   : > { %v952_v51 = vadd.f32 %v1764_v53, %v779_v46 }
  0xdd   : > { %v999_v45 = vmax.f32 %v967_v43, 0.0 }
  0xde   : > { %v984_v58 = vmax.f32 %v952_v51, 0.0 }
  0xdf   : > { %v1492_v47 = vpack.c.bf16 %v999_v45, %v998_v44 }
  0xe0   : > { %v729_v48 = vpop.f32.mrf.mxu2 }
  0xe1   : > { %1528 = vst [vmem:[%s1774_s29 + $0x50] sm:$0xff] %v1492_v47   ;;  %v691_v50 = vpop.f32.mrf.mxu0  ;;  %v819_v57 = vadd.f32 %v818_v25, %v729_v48  ;;  %v825_v4 = vpop.f32.mrf.mxu3 }
  0xe2   : > { %v783_v49 = vpop.f32.mrf.mxu1  ;;  %v781_v52 = vadd.f32 %v780_v41, %v691_v50 }
  0xe3   : > { %v968_v62 = vadd.f32 %v1764_v53, %v819_v57 }
  0xe4   : > { %v953_v56 = vadd.f32 %v1764_v53, %v781_v52 }
  0xe5   : > { %v1000_v5 = vmax.f32 %v968_v62, 0.0 }
  0xe6   : > { %v985_v59 = vmax.f32 %v953_v56, 0.0 }
  0xe8   : > { %v1457_v60 = vpack.c.bf16 %v985_v59, %v984_v58  ;;  %v731_v61 = vpop.f32.mrf.mxu2 }
  0xe9   : > { %v821_v63 = vadd.f32 %v820_v38, %v731_v61  ;;  %v694_v2 = vpop.f32.mrf.mxu0  ;;  %v828_v18 = vpop.f32.mrf.mxu3 }
  0xea   : > { %v785_v1 = vpop.f32.mrf.mxu1  ;;  %1521 = vst [vmem:[%s1774_s29 + $0x18] sm:$0xff] %v1457_v60   ;;  %v784_v7 = vadd.f32 %v783_v49, %v694_v2 }
  0xeb   : > { %v969_v3 = vadd.f32 %v1764_v53, %v821_v63 }
  0xec   : > { %v954_v12 = vadd.f32 %v1764_v53, %v784_v7 }
  0xed   : > { %v1001_v6 = vmax.f32 %v969_v3, 0.0 }
  0xee   : > { %v986_v16 = vmax.f32 %v954_v12, 0.0 }
  0xef   : > { %v1497_v8 = vpack.c.bf16 %v1001_v6, %v1000_v5 }
  0xf0   : > { %v734_v9 = vpop.f32.mrf.mxu2 }
  0xf1   : > { %1529 = vst [vmem:[%s1774_s29 + $0x58] sm:$0xff] %v1497_v8   ;;  %v696_v11 = vpop.f32.mrf.mxu0  ;;  %v824_v15 = vadd.f32 %v823_v55, %v734_v9  ;;  %v830_v31 = vpop.f32.mrf.mxu3 }
  0xf2   : > { %v788_v10 = vpop.f32.mrf.mxu1  ;;  %v786_v13 = vadd.f32 %v785_v1, %v696_v11 }
  0xf3   : > { %v970_v21 = vadd.f32 %v1764_v53, %v824_v15 }
  0xf4   : > { %v955_v14 = vadd.f32 %v1764_v53, %v786_v13 }
  0xf5   : > { %v1002_v26 = vmax.f32 %v970_v21, 0.0 }
  0xf6   : > { %v987_v17 = vmax.f32 %v955_v14, 0.0 }
  0xf8   : > { %v1462_v19 = vpack.c.bf16 %v987_v17, %v986_v16  ;;  %v736_v20 = vpop.f32.mrf.mxu2 }
  0xf9   : > { %v826_v22 = vadd.f32 %v825_v4, %v736_v20  ;;  %v699_v24 = vpop.f32.mrf.mxu0  ;;  %v833_v46 = vpop.f32.mrf.mxu3 }
  0xfa   : > { %v790_v23 = vpop.f32.mrf.mxu1  ;;  %1522 = vst [vmem:[%s1774_s29 + $0x20] sm:$0xff] %v1462_v19   ;;  %v789_v28 = vadd.f32 %v788_v10, %v699_v24 }
  0xfb   : > { %v971_v25 = vadd.f32 %v1764_v53, %v826_v22 }
  0xfc   : > { %v956_v34 = vadd.f32 %v1764_v53, %v789_v28 }
  0xfd   : > { %v1003_v27 = vmax.f32 %v971_v25, 0.0 }
  0xfe   : > { %v988_v38 = vmax.f32 %v956_v34, 0.0 }
  0xff   : > { %v1502_v29 = vpack.c.bf16 %v1003_v27, %v1002_v26 }
 0x100   : > { %v739_v30 = vpop.f32.mrf.mxu2 }
 0x101   : > { %1530 = vst [vmem:[%s1774_s29 + $0x60] sm:$0xff] %v1502_v29   ;;  %v701_v33 = vpop.f32.mrf.mxu0  ;;  %v829_v37 = vadd.f32 %v828_v18, %v739_v30  ;;  %v835_v59 = vpop.f32.mrf.mxu3 }
 0x102   : > { %v793_v32 = vpop.f32.mrf.mxu1  ;;  %v791_v35 = vadd.f32 %v790_v23, %v701_v33 }
 0x103   : > { %v972_v42 = vadd.f32 %v1764_v53, %v829_v37 }
 0x104   : > { %v957_v36 = vadd.f32 %v1764_v53, %v791_v35 }
 0x105   : > { %v1004_v48 = vmax.f32 %v972_v42, 0.0 }
 0x106   : > { %v989_v39 = vmax.f32 %v957_v36, 0.0 }
 0x108   : > { %v1467_v40 = vpack.c.bf16 %v989_v39, %v988_v38  ;;  %v741_v41 = vpop.f32.mrf.mxu2 }
 0x109   : > { %v831_v43 = vadd.f32 %v830_v31, %v741_v41  ;;  %v704_v45 = vpop.f32.mrf.mxu0  ;;  %v838_v10 = vpop.f32.mrf.mxu3 }
 0x10a   : > { %v795_v44 = vpop.f32.mrf.mxu1  ;;  %1523 = vst [vmem:[%s1774_s29 + $0x28] sm:$0xff] %v1467_v40   ;;  %v794_v50 = vadd.f32 %v793_v32, %v704_v45 }
 0x10b   : > { %v973_v47 = vadd.f32 %v1764_v53, %v831_v43 }
 0x10c   : > { %v958_v57 = vadd.f32 %v1764_v53, %v794_v50 }
 0x10d   : > { %v1005_v49 = vmax.f32 %v973_v47, 0.0 }
 0x10e   : > { %v990_v62 = vmax.f32 %v958_v57, 0.0 }
 0x10f   : > { %v1507_v51 = vpack.c.bf16 %v1005_v49, %v1004_v48 }
 0x110   : > { %v744_v52 = vpop.f32.mrf.mxu2 }
 0x111   : > { %1531 = vst [vmem:[%s1774_s29 + $0x68] sm:$0xff] %v1507_v51   ;;  %v706_v56 = vpop.f32.mrf.mxu0  ;;  %v834_v61 = vadd.f32 %v833_v46, %v744_v52  ;;  %v840_v23 = vpop.f32.mrf.mxu3 }
 0x112   : > { %v798_v55 = vpop.f32.mrf.mxu1  ;;  %v796_v58 = vadd.f32 %v795_v44, %v706_v56 }
 0x113   : > { %v974_v3 = vadd.f32 %v1764_v53, %v834_v61 }
 0x114   : > { %v959_v60 = vadd.f32 %v1764_v53, %v796_v58 }
 0x115   : > { %v1006_v8 = vmax.f32 %v974_v3, 0.0 }
 0x116   : > { %v991_v63 = vmax.f32 %v959_v60, 0.0 }
 0x118   : > { %v1472_v1 = vpack.c.bf16 %v991_v63, %v990_v62  ;;  %v746_v2 = vpop.f32.mrf.mxu2 }
 0x119   : > { %v836_v4 = vadd.f32 %v835_v59, %v746_v2  ;;  %v709_v6 = vpop.f32.mrf.mxu0 }
 0x11a   : > { %v800_v5 = vpop.f32.mrf.mxu1  ;;  %1524 = vst [vmem:[%s1774_s29 + $0x30] sm:$0xff] %v1472_v1   ;;  %v799_v11 = vadd.f32 %v798_v55, %v709_v6 }
 0x11b   : > { %v975_v7 = vadd.f32 %v1764_v53, %v836_v4 }
 0x11c   : > { %v960_v16 = vadd.f32 %v1764_v53, %v799_v11 }
 0x11d   : > { %v1007_v9 = vmax.f32 %v975_v7, 0.0 }
 0x11e   : > { %v992_v20 = vmax.f32 %v960_v16, 0.0 }
 0x11f   : > { %v1512_v12 = vpack.c.bf16 %v1007_v9, %v1006_v8 }
 0x120   : > { %v749_v13 = vpop.f32.mrf.mxu2 }
 0x121   : > { %1532 = vst [vmem:[%s1774_s29 + $0x70] sm:$0xff] %v1512_v12   ;;  %v711_v15 = vpop.f32.mrf.mxu0  ;;  %v839_v19 = vadd.f32 %v838_v10, %v749_v13 }
 0x122   : > { %v803_v14 = vpop.f32.mrf.mxu1  ;;  %v801_v17 = vadd.f32 %v800_v5, %v711_v15 }
 0x123   : > { %v804_v21 = vadd.f32 %v803_v14, %v1766_v54  ;;  %v976_v26 = vadd.f32 %v1764_v53, %v839_v19 }
 0x124   : > { %v961_v18 = vadd.f32 %v1764_v53, %v801_v17 }
 0x125   : > { %v962_v29 = vadd.f32 %v1764_v53, %v804_v21  ;;  %v1008_v54 = vmax.f32 %v976_v26, 0.0 }
 0x126   : > { %v993_v22 = vmax.f32 %v961_v18, 0.0 }
 0x127   : > { %v994_v34 = vmax.f32 %v962_v29, 0.0 }
 0x128   : > { %v1477_v24 = vpack.c.bf16 %v993_v22, %v992_v20  ;;  %v751_v25 = vpop.f32.mrf.mxu2 }
 0x129   : > { %v841_v27 = vadd.f32 %v840_v23, %v751_v25 }
 0x12a   : > { %v805_v28 = vpop.f32.mrf.mxu1  ;;  %1525 = vst [vmem:[%s1774_s29 + $0x38] sm:$0xff] %v1477_v24  }
 0x12b   : > { %v806_v30 = vadd.f32 %v805_v28, %v1776_v0  ;;  %v977_v31 = vadd.f32 %v1764_v53, %v841_v27 }
 0x12d   : > { %v963_v32 = vadd.f32 %v1764_v53, %v806_v30  ;;  %v1009_v33 = vmax.f32 %v977_v31, 0.0 }
 0x12f   : > { %v995_v35 = vmax.f32 %v963_v32, 0.0  ;;  %v1517_v36 = vpack.c.bf16 %v1009_v33, %v1008_v54 }
 0x131   : > { %v1482_v37 = vpack.c.bf16 %v995_v35, %v994_v34  ;;  %1533 = vst [vmem:[%s1774_s29 + $0x78] sm:$0xff] %v1517_v36  }
 0x133   : > { %1526 = vst [vmem:[%s1774_s29 + $0x40] sm:$0xff] %v1482_v37  }
 0x134 PF: > { %s13_s14 = sadd.s32 1, %s1594_s14   ;;  %s1839_s12 = smov %s1590_s13 }
 0x135   : > { %p10_p5 = scmp.ge.s32.totalorder %s13_s14, 4   ;;  %s1840_s13 = smov %s1842_s15 }
 0x137   :  { %12 = sbr.rel (!%p10_p5) target bundleno = 2 (0x2), region = 76 }

// kernel: fwd.5
= control target key start
LH: loop header
LB: loop body
LE: loop exit
PB: predicated region body
PF: predicated region fallthrough
CT: control target
= control target key end

     0   :  { %s1565_s12 = smov 0   ;;  %s1567_s13 = smov 0   ;;  %s1772_s0 = inlined_call_operand.vmem [shape: bf16[512,144], index: 0, kind: input, shape index: {}]   ;;  %s1773_s1 = inlined_call_operand.vmem [shape: bf16[144,128], index: 1, kind: input, shape index: {}]   ;;  %s1774_s2 = inlined_call_operand.vmem [shape: f32[1,128], index: 2, kind: input, shape index: {}]   ;;  %s1775_s3 = inlined_call_operand.vmem [shape: bf16[512,128], index: 3, kind: output, shape index: {}]  }
   0x1   :  { %s1569_s14 = smov 0  }
   0x2 LB: > { %s32_s15 = sadd.s32 1, %s1539_s13  ;;  %p1162_p0 = scmp.ge.s32.totalorder %s1543_s14, 1  ;;  %s1543_s14 = sphi %s1569_s14, %s13_s14   ;;  %s1539_s13 = sphi %s1567_s13, %s1777_s13   ;;  %s1535_s12 = sphi %s1565_s12, %s1776_s12  }
   0x3   : > { %p34_p1 = scmp.ge.s32.totalorder %s32_s15, 2  ;;  %p191_p2 = scmp.lt.s32.totalorder %s1543_s14, 3 }
   0x5   : > { %s1779_s15 = smov (%p34_p1, %s32_s15), 0  ;;  %p192_p3 = pnand %p1162_p0, %p191_p2 }
   0x6   : > { %s1163_s20 = sshll.u32 (!%p192_p3), %s1535_s12, 5 }
   0x7   : > { %195 = sbr.rel (%p192_p3) target bundleno = 305 (0x131), region = 32  ;;  %p236_p4 = scmp.lt.s32.totalorder (!%p192_p3), %s1163_s20, 63 }
   0xc   : > { %v1390_v0 = vld [vmem:[%s1773_s1 + $0x38] sm:$0xff]  ;;  %v1391_v1 = vld [vmem:[%s1773_s1 + $0x40] sm:$0xff]  ;;  %v1389_v2 = vld [vmem:[%s1773_s1 + $0x30] sm:$0xff]  ;;  %s1781_s20 = smov (!%p236_p4, %s1163_s20), 63  ;;  %vm584_vm0 = vcmask 130048  }
   0xd   : > { %633 = vmatpush.bf16.msra.mxu0 %v1390_v0  ;;  %1487 = vmatpush.bf16.msra.mxu2 %v1390_v0  ;;  %s1350_s23 = sshll.u32 %s1781_s20, 3  ;;  %v1388_v3 = vld [vmem:[%s1773_s1 + $0x28] sm:$0xff]  ;;  %v1387_v7 = vld [vmem:[%s1773_s1 + $0x20] sm:$0xff]  ;;  %v1386_v11 = vld [vmem:[%s1773_s1 + $0x18] sm:$0xff]  ;;  %s1167_s17 = sshll.u32 %s1781_s20, 2 }
   0xe   : > { %729 = vmatpush.bf16.msra.mxu1 %v1391_v1  ;;  %1495 = vmatpush.bf16.msra.mxu3 %v1391_v1  ;;  %s1598_s26 = scalar_lea.vmem %s1772_s0, %s1350_s23  ;;  %v1385_v12 = vld [vmem:[%s1773_s1 + $0x10] sm:$0xff]  ;;  %v1384_v16 = vld [vmem:[%s1773_s1 + $0x8] sm:$0xff]  ;;  %v1383_v20 = vld [vmem:[%s1773_s1] sm:$0xff]  ;;  %s1711_s21 = scalar_lea.vmem %s1775_s3, %s1167_s17 }
   0xf   : > { %v1351_v4 = vld [vmem:[%s1598_s26 + $0x4] sm:$0xf]  ;;  %v1172_v5 = vld [vmem:[%s1598_s26 + $0x8] sm:$0xf0]  ;;  %v1369_v8 = vld [vmem:[%s1598_s26 + $0x94] sm:$0xf] }
  0x10   : > { %v1175_v6 = vor.u32 %v1351_v4, %v1172_v5  ;;  %v1244_v9 = vld [vmem:[%s1598_s26 + $0x98] sm:$0xf0]  ;;  %v1353_v13 = vld [vmem:[%s1598_s26 + $0x14] sm:$0xf]  ;;  %v1371_v17 = vld [vmem:[%s1598_s26 + $0xa4] sm:$0xf] }
  0x11   : > { %634 = vmatpush.bf16.msra.mxu0 %v1389_v2  ;;  %1488 = vmatpush.bf16.msra.mxu2 %v1389_v2  ;;  %v1247_v10 = vor.u32 %v1369_v8, %v1244_v9  ;;  %v1180_v14 = vld [vmem:[%s1598_s26 + $0x18] sm:$0xf0]  ;;  %v1252_v18 = vld [vmem:[%s1598_s26 + $0xa8] sm:$0xf0]  ;;  %v1170_v21 = vld [vmem:[%s1598_s26] sm:$0xf] }
  0x12   : > { %1332 = vmatmul.msk.bf16.vlgmr.msra.gmra.mxu1 %vm584_vm0, %v1175_v6  ;;  %v1183_v15 = vor.u32 %v1353_v13, %v1180_v14  ;;  %v1255_v19 = vor.u32 %v1371_v17, %v1252_v18  ;;  %v1352_v22 = vld [vmem:[%s1598_s26 + $0x4] sm:$0xf0]  ;;  %v1234_v23 = vld [vmem:[%s1598_s26 + $0x80] sm:$0xf]  ;;  %v1355_v27 = vld [vmem:[%s1598_s26 + $0x24] sm:$0xf] }
  0x13   : > { %1341 = vmatmul.msk.bf16.vlgmr.msra.gmra.mxu3 %vm584_vm0, %v1247_v10  ;;  %v1368_v24 = vld [vmem:[%s1598_s26 + $0x84] sm:$0xf0]  ;;  %v1171_v25 = vor.u32 %v1352_v22, %v1170_v21  ;;  %v1188_v28 = vld [vmem:[%s1598_s26 + $0x28] sm:$0xf0]  ;;  %v1373_v30 = vld [vmem:[%s1598_s26 + $0xb4] sm:$0xf] }
  0x14   : > { %v1235_v26 = vor.u32 %v1368_v24, %v1234_v23  ;;  %v1191_v29 = vor.u32 %v1355_v27, %v1188_v28  ;;  %v1260_v31 = vld [vmem:[%s1598_s26 + $0xb8] sm:$0xf0]  ;;  %v1178_v33 = vld [vmem:[%s1598_s26 + $0x10] sm:$0xf]  ;;  %v1354_v34 = vld [vmem:[%s1598_s26 + $0x14] sm:$0xf0] }
  0x15   : > { %635 = vmatpush.bf16.msra.mxu0 %v1388_v3  ;;  %1489 = vmatpush.bf16.msra.mxu2 %v1388_v3  ;;  %v1263_v32 = vor.u32 %v1373_v30, %v1260_v31  ;;  %v1242_v35 = vld [vmem:[%s1598_s26 + $0x90] sm:$0xf]  ;;  %v1370_v36 = vld [vmem:[%s1598_s26 + $0x94] sm:$0xf0]  ;;  %v1179_v37 = vor.u32 %v1354_v34, %v1178_v33  ;;  %v1357_v39 = vld [vmem:[%s1598_s26 + $0x34] sm:$0xf] }
  0x16   : > { %v1243_v38 = vor.u32 %v1370_v36, %v1242_v35  ;;  %v1196_v40 = vld [vmem:[%s1598_s26 + $0x38] sm:$0xf0]  ;;  %v1375_v42 = vld [vmem:[%s1598_s26 + $0xc4] sm:$0xf]  ;;  %v1268_v43 = vld [vmem:[%s1598_s26 + $0xc8] sm:$0xf0] }
  0x17   : > { %v1199_v41 = vor.u32 %v1357_v39, %v1196_v40  ;;  %v1271_v44 = vor.u32 %v1375_v42, %v1268_v43  ;;  %v1186_v45 = vld [vmem:[%s1598_s26 + $0x20] sm:$0xf]  ;;  %v1356_v46 = vld [vmem:[%s1598_s26 + $0x24] sm:$0xf0]  ;;  %v1359_v51 = vld [vmem:[%s1598_s26 + $0x44] sm:$0xf] }
  0x18   : > { %v1250_v47 = vld [vmem:[%s1598_s26 + $0xa0] sm:$0xf]  ;;  %v1372_v48 = vld [vmem:[%s1598_s26 + $0xa4] sm:$0xf0]  ;;  %v1187_v49 = vor.u32 %v1356_v46, %v1186_v45  ;;  %v1204_v52 = vld [vmem:[%s1598_s26 + $0x48] sm:$0xf0] }
  0x19   : > { %636 = vmatpush.bf16.msra.mxu0 %v1387_v7  ;;  %1490 = vmatpush.bf16.msra.mxu2 %v1387_v7  ;;  %v1251_v50 = vor.u32 %v1372_v48, %v1250_v47  ;;  %v1207_v53 = vor.u32 %v1359_v51, %v1204_v52  ;;  %v1377_v54 = vld [vmem:[%s1598_s26 + $0xd4] sm:$0xf]  ;;  %v1276_v55 = vld [vmem:[%s1598_s26 + $0xd8] sm:$0xf0]  ;;  %v1194_v57 = vld [vmem:[%s1598_s26 + $0x30] sm:$0xf] }
  0x1a   : > { %v1279_v56 = vor.u32 %v1377_v54, %v1276_v55  ;;  %v1358_v58 = vld [vmem:[%s1598_s26 + $0x34] sm:$0xf0]  ;;  %v1258_v59 = vld [vmem:[%s1598_s26 + $0xb0] sm:$0xf]  ;;  %v1361_v63 = vld [vmem:[%s1598_s26 + $0x54] sm:$0xf] }
  0x1b   : > { %v1374_v60 = vld [vmem:[%s1598_s26 + $0xb4] sm:$0xf0]  ;;  %v1195_v61 = vor.u32 %v1358_v58, %v1194_v57  ;;  %v1212_v0 = vld [vmem:[%s1598_s26 + $0x58] sm:$0xf0]  ;;  %v1379_v2 = vld [vmem:[%s1598_s26 + $0xe4] sm:$0xf] }
  0x1c   : > { %v1259_v62 = vor.u32 %v1374_v60, %v1258_v59  ;;  %v1215_v1 = vor.u32 %v1361_v63, %v1212_v0  ;;  %v1284_v3 = vld [vmem:[%s1598_s26 + $0xe8] sm:$0xf0]  ;;  %v1202_v5 = vld [vmem:[%s1598_s26 + $0x40] sm:$0xf]  ;;  %v1360_v6 = vld [vmem:[%s1598_s26 + $0x44] sm:$0xf0] }
  0x1d   : > { %637 = vmatpush.bf16.msra.mxu0 %v1386_v11  ;;  %1491 = vmatpush.bf16.msra.mxu2 %v1386_v11  ;;  %v1287_v4 = vor.u32 %v1379_v2, %v1284_v3  ;;  %v1266_v7 = vld [vmem:[%s1598_s26 + $0xc0] sm:$0xf]  ;;  %v1376_v8 = vld [vmem:[%s1598_s26 + $0xc4] sm:$0xf0]  ;;  %v1203_v9 = vor.u32 %v1360_v6, %v1202_v5  ;;  %v1363_v11 = vld [vmem:[%s1598_s26 + $0x64] sm:$0xf] }
  0x1e   : > { %v1267_v10 = vor.u32 %v1376_v8, %v1266_v7  ;;  %v1381_v14 = vld [vmem:[%s1598_s26 + $0xf4] sm:$0xf]  ;;  %v1210_v17 = vld [vmem:[%s1598_s26 + $0x50] sm:$0xf]  ;;  %v1362_v18 = vld [vmem:[%s1598_s26 + $0x54] sm:$0xf0] }
  0x1f   : > { %v1211_v21 = vor.u32 %v1362_v18, %v1210_v17  ;;  %v1365_v23 = vld [vmem:[%s1598_s26 + $0x74] sm:$0xf]  ;;  %v1228_v24 = vld [vmem:[%s1598_s26 + $0x78] sm:$0xf0]  ;;  %v1364_v27 = vld [vmem:[%s1598_s26 + $0x64] sm:$0xf0] }
  0x20   : > { %v1282_v28 = vld [vmem:[%s1598_s26 + $0xe0] sm:$0xf]  ;;  %v1236_v33 = vld [vmem:[%s1598_s26 + $0x88] sm:$0xf0]  ;;  %v1226_v36 = vld [vmem:[%s1598_s26 + $0x70] sm:$0xf] }
  0x21   : > { %638 = vmatpush.bf16.msra.mxu0 %v1385_v12  ;;  %1492 = vmatpush.bf16.msra.mxu2 %v1385_v12  ;;  %v1220_v12 = vld [vmem:[%s1598_s26 + $0x68] sm:$0xf0]  ;;  %v1382_v39 = vld [vmem:[%s1598_s26 + $0xf4] sm:$0xf0]  ;;  %v1701_v48 = vld [vmem:[%s1774_s2] ss:$0 sm:$0xff] }
  0x22   : > { %1333 = vmatmul.msk.bf16.gmra.mxu1 %vm584_vm0, %v1183_v15  ;;  %v1223_v13 = vor.u32 %v1363_v11, %v1220_v12  ;;  %v1292_v15 = vld [vmem:[%s1598_s26 + $0xf8] sm:$0xf0] }
  0x23   : > { %1342 = vmatmul.msk.bf16.gmra.mxu3 %vm584_vm0, %v1255_v19  ;;  %v1274_v19 = vld [vmem:[%s1598_s26 + $0xd0] sm:$0xf] }
  0x25   : > { %639 = vmatpush.bf16.msra.mxu0 %v1384_v16  ;;  %1493 = vmatpush.bf16.msra.mxu2 %v1384_v16  ;;  %v1295_v16 = vor.u32 %v1381_v14, %v1292_v15 }
  0x29   : > { %640 = vmatpush.bf16.msra.mxu0 %v1383_v20  ;;  %1494 = vmatpush.bf16.msra.mxu2 %v1383_v20  ;;  %v1378_v20 = vld [vmem:[%s1598_s26 + $0xd4] sm:$0xf0] }
  0x2a   : > { %v1275_v22 = vor.u32 %v1378_v20, %v1274_v19 }
  0x2c   : > { %641 = vmatmul.bf16.vlgmr.msra.gmra.mxu0 %v1171_v25  ;;  %681 = vmatmul.bf16.vlgmr.msra.gmra.mxu2 %v1235_v26  ;;  %v1231_v25 = vor.u32 %v1365_v23, %v1228_v24  ;;  %v1218_v26 = vld [vmem:[%s1598_s26 + $0x60] sm:$0xf] }
  0x2d   : > { %v1219_v30 = vor.u32 %v1364_v27, %v1218_v26 }
  0x32   : > { %1334 = vmatmul.msk.bf16.gmra.mxu1 %vm584_vm0, %v1191_v29  ;;  %v1380_v29 = vld [vmem:[%s1598_s26 + $0xe4] sm:$0xf0] }
  0x33   : > { %1343 = vmatmul.msk.bf16.gmra.mxu3 %vm584_vm0, %v1263_v32  ;;  %v1283_v31 = vor.u32 %v1380_v29, %v1282_v28  ;;  %v1367_v32 = vld [vmem:[%s1598_s26 + $0x84] sm:$0xf] }
  0x34   : > { %v1239_v34 = vor.u32 %v1367_v32, %v1236_v33 }
  0x3c   : > { %646 = vmatmul.bf16.gmra.mxu0 %v1179_v37  ;;  %686 = vmatmul.bf16.gmra.mxu2 %v1243_v38  ;;  %v1366_v37 = vld [vmem:[%s1598_s26 + $0x74] sm:$0xf0]  ;;  %v1290_v38 = vld [vmem:[%s1598_s26 + $0xf0] sm:$0xf] }
  0x3d   : > { %v1227_v40 = vor.u32 %v1366_v37, %v1226_v36 }
  0x42   : > { %1335 = vmatmul.msk.bf16.gmra.mxu1 %vm584_vm0, %v1199_v41  ;;  %v1291_v41 = vor.u32 %v1382_v39, %v1290_v38 }
  0x43   : > { %1344 = vmatmul.msk.bf16.gmra.mxu3 %vm584_vm0, %v1271_v44 }
  0x4c   : > { %651 = vmatmul.bf16.gmra.mxu0 %v1187_v49  ;;  %691 = vmatmul.bf16.gmra.mxu2 %v1251_v50 }
  0x52   : > { %1336 = vmatmul.msk.bf16.gmra.mxu1 %vm584_vm0, %v1207_v53 }
  0x53   : > { %1345 = vmatmul.msk.bf16.gmra.mxu3 %vm584_vm0, %v1279_v56 }
  0x5c   : > { %656 = vmatmul.bf16.gmra.mxu0 %v1195_v61  ;;  %696 = vmatmul.bf16.gmra.mxu2 %v1259_v62 }
  0x62   : > { %1337 = vmatmul.msk.bf16.gmra.mxu1 %vm584_vm0, %v1215_v1 }
  0x63   : > { %1346 = vmatmul.msk.bf16.gmra.mxu3 %vm584_vm0, %v1287_v4 }
  0x6c   : > { %661 = vmatmul.bf16.gmra.mxu0 %v1203_v9  ;;  %701 = vmatmul.bf16.gmra.mxu2 %v1267_v10 }
  0x72   : > { %1338 = vmatmul.msk.bf16.gmra.mxu1 %vm584_vm0, %v1223_v13 }
  0x73   : > { %1347 = vmatmul.msk.bf16.gmra.mxu3 %vm584_vm0, %v1295_v16 }
  0x7c   : > { %666 = vmatmul.bf16.gmra.mxu0 %v1211_v21  ;;  %706 = vmatmul.bf16.gmra.mxu2 %v1275_v22 }
  0x82   : > { %1339 = vmatmul.msk.bf16.gmra.mxu1 %vm584_vm0, %v1231_v25 }
  0x8c   : > { %671 = vmatmul.bf16.gmra.mxu0 %v1219_v30  ;;  %711 = vmatmul.bf16.gmra.mxu2 %v1283_v31 }
  0x8f   : > { %v731_v35 = vpop.f32.mrf.mxu1 }
  0x92   : > { %1340 = vmatmul.msk.bf16.gmra.mxu1 %vm584_vm0, %v1239_v34 }
  0x96   : > { %v776_v44 = vpop.f32.mrf.mxu3 }
  0x97   : > { %v733_v42 = vpop.f32.mrf.mxu1 }
  0x9c   : > { %676 = vmatmul.bf16.gmra.mxu0 %v1227_v40  ;;  %716 = vmatmul.bf16.gmra.mxu2 %v1291_v41 }
  0x9e   : > { %v778_v50 = vpop.f32.mrf.mxu3 }
  0x9f   : > { %v736_v43 = vpop.f32.mrf.mxu1 }
  0xa6   : > { %v781_v62 = vpop.f32.mrf.mxu3 }
  0xa7   : > { %v738_v46 = vpop.f32.mrf.mxu1 }
  0xa9   : > { %v642_v45 = vpop.f32.mrf.mxu0 }
  0xaa   : > { %v732_v47 = vadd.f32 %v731_v35, %v642_v45 }
  0xac   : > { %v914_v52 = vadd.f32 %v1701_v48, %v732_v47 }
  0xae   : > { %v946_v56 = vmax.f32 %v914_v52, 0.0  ;;  %v783_v6 = vpop.f32.mrf.mxu3 }
  0xaf   : > { %v1703_v49 = vpop.f32.mrf.mxu2  ;;  %v741_v54 = vpop.f32.mrf.mxu1 }
  0xb1   : > { %v644_v51 = vpop.f32.mrf.mxu0 }
  0xb2   : > { %v734_v53 = vadd.f32 %v733_v42, %v644_v51 }
  0xb4   : > { %v915_v55 = vadd.f32 %v1701_v48, %v734_v53 }
  0xb6   : > { %v947_v57 = vmax.f32 %v915_v55, 0.0  ;;  %v786_v20 = vpop.f32.mrf.mxu3 }
  0xb7   : > { %v1713_v59 = vpop.f32.mrf.mxu2  ;;  %v743_v61 = vpop.f32.mrf.mxu1 }
  0xb8   : > { %v1395_v58 = vpack.c.bf16 %v947_v57, %v946_v56 }
  0xb9   : > { %v647_v60 = vpop.f32.mrf.mxu0 }
  0xba   : > { %1396 = vst [vmem:[%s1711_s21] sm:$0xff] %v1395_v58   ;;  %v737_v63 = vadd.f32 %v736_v43, %v647_v60 }
  0xbc   : > { %v916_v2 = vadd.f32 %v1701_v48, %v737_v63 }
  0xbe   : > { %v948_v8 = vmax.f32 %v916_v2, 0.0  ;;  %v788_v33 = vpop.f32.mrf.mxu3 }
  0xbf   : > { %v687_v0 = vpop.f32.mrf.mxu2  ;;  %v746_v4 = vpop.f32.mrf.mxu1 }
  0xc0   : > { %v777_v7 = vadd.f32 %v776_v44, %v687_v0 }
  0xc1   : > { %v649_v1 = vpop.f32.mrf.mxu0 }
  0xc2   : > { %v739_v3 = vadd.f32 %v738_v46, %v649_v1  ;;  %v932_v12 = vadd.f32 %v1701_v48, %v777_v7 }
  0xc4   : > { %v917_v5 = vadd.f32 %v1701_v48, %v739_v3  ;;  %v964_v17 = vmax.f32 %v932_v12, 0.0 }
  0xc6   : > { %v949_v9 = vmax.f32 %v917_v5, 0.0 }
  0xc7   : > { %v689_v11 = vpop.f32.mrf.mxu2  ;;  %v748_v15 = vpop.f32.mrf.mxu1 }
  0xc8   : > { %v1400_v10 = vpack.c.bf16 %v949_v9, %v948_v8  ;;  %v779_v13 = vadd.f32 %v778_v50, %v689_v11  ;;  %v791_v50 = vpop.f32.mrf.mxu3 }
  0xc9   : > { %v652_v14 = vpop.f32.mrf.mxu0 }
  0xca   : > { %1472 = vst [vmem:[%s1711_s21 + $0x8] sm:$0xff] %v1400_v10   ;;  %v933_v16 = vadd.f32 %v1701_v48, %v779_v13  ;;  %v742_v19 = vadd.f32 %v741_v54, %v652_v14 }
  0xcc   : > { %v965_v18 = vmax.f32 %v933_v16, 0.0  ;;  %v918_v24 = vadd.f32 %v1701_v48, %v742_v19 }
  0xce   : > { %v1440_v21 = vpack.c.bf16 %v965_v18, %v964_v17  ;;  %v950_v29 = vmax.f32 %v918_v24, 0.0 }
  0xcf   : > { %v692_v22 = vpop.f32.mrf.mxu2  ;;  %v751_v26 = vpop.f32.mrf.mxu1 }
  0xd0   : > { %1480 = vst [vmem:[%s1711_s21 + $0x48] sm:$0xff] %v1440_v21   ;;  %v782_v28 = vadd.f32 %v781_v62, %v692_v22  ;;  %v793_v63 = vpop.f32.mrf.mxu3 }
  0xd1   : > { %v654_v23 = vpop.f32.mrf.mxu0 }
  0xd2   : > { %v744_v25 = vadd.f32 %v743_v61, %v654_v23  ;;  %v934_v34 = vadd.f32 %v1701_v48, %v782_v28 }
  0xd4   : > { %v919_v27 = vadd.f32 %v1701_v48, %v744_v25  ;;  %v966_v39 = vmax.f32 %v934_v34, 0.0 }
  0xd6   : > { %v951_v30 = vmax.f32 %v919_v27, 0.0 }
  0xd7   : > { %v694_v32 = vpop.f32.mrf.mxu2  ;;  %v753_v37 = vpop.f32.mrf.mxu1 }
  0xd8   : > { %v1405_v31 = vpack.c.bf16 %v951_v30, %v950_v29  ;;  %v784_v35 = vadd.f32 %v783_v6, %v694_v32  ;;  %v796_v13 = vpop.f32.mrf.mxu3 }
  0xd9   : > { %v657_v36 = vpop.f32.mrf.mxu0 }
  0xda   : > { %1473 = vst [vmem:[%s1711_s21 + $0x10] sm:$0xff] %v1405_v31   ;;  %v935_v38 = vadd.f32 %v1701_v48, %v784_v35  ;;  %v747_v41 = vadd.f32 %v746_v4, %v657_v36 }
  0xdc   : > { %v967_v40 = vmax.f32 %v935_v38, 0.0  ;;  %v920_v45 = vadd.f32 %v1701_v48, %v747_v41 }
  0xde   : > { %v1445_v42 = vpack.c.bf16 %v967_v40, %v966_v39  ;;  %v952_v53 = vmax.f32 %v920_v45, 0.0 }
  0xdf   : > { %v697_v43 = vpop.f32.mrf.mxu2  ;;  %v756_v47 = vpop.f32.mrf.mxu1 }
  0xe0   : > { %1481 = vst [vmem:[%s1711_s21 + $0x50] sm:$0xff] %v1445_v42   ;;  %v787_v52 = vadd.f32 %v786_v20, %v697_v43 }
  0xe1   : > { %v659_v44 = vpop.f32.mrf.mxu0 }
  0xe2   : > { %v749_v46 = vadd.f32 %v748_v15, %v659_v44  ;;  %v936_v57 = vadd.f32 %v1701_v48, %v787_v52 }
  0xe4   : > { %v921_v51 = vadd.f32 %v1701_v48, %v749_v46  ;;  %v968_v0 = vmax.f32 %v936_v57, 0.0 }
  0xe6   : > { %v953_v54 = vmax.f32 %v921_v51, 0.0 }
  0xe7   : > { %v699_v56 = vpop.f32.mrf.mxu2  ;;  %v758_v61 = vpop.f32.mrf.mxu1 }
  0xe8   : > { %v1410_v55 = vpack.c.bf16 %v953_v54, %v952_v53  ;;  %v789_v58 = vadd.f32 %v788_v33, %v699_v56 }
  0xe9   : > { %v662_v60 = vpop.f32.mrf.mxu0 }
  0xea   : > { %1474 = vst [vmem:[%s1711_s21 + $0x18] sm:$0xff] %v1410_v55   ;;  %v937_v62 = vadd.f32 %v1701_v48, %v789_v58  ;;  %v752_v2 = vadd.f32 %v751_v26, %v662_v60  ;;  %v798_v26 = vpop.f32.mrf.mxu3 }
  0xec   : > { %v969_v1 = vmax.f32 %v937_v62, 0.0  ;;  %v922_v6 = vadd.f32 %v1701_v48, %v752_v2 }
  0xee   : > { %v1450_v3 = vpack.c.bf16 %v969_v1, %v968_v0  ;;  %v954_v11 = vmax.f32 %v922_v6, 0.0 }
  0xef   : > { %v702_v4 = vpop.f32.mrf.mxu2  ;;  %v761_v8 = vpop.f32.mrf.mxu1 }
  0xf0   : > { %1482 = vst [vmem:[%s1711_s21 + $0x58] sm:$0xff] %v1450_v3   ;;  %v792_v10 = vadd.f32 %v791_v50, %v702_v4 }
  0xf1   : > { %v664_v5 = vpop.f32.mrf.mxu0 }
  0xf2   : > { %v754_v7 = vadd.f32 %v753_v37, %v664_v5  ;;  %v938_v16 = vadd.f32 %v1701_v48, %v792_v10  ;;  %v801_v40 = vpop.f32.mrf.mxu3 }
  0xf4   : > { %v923_v9 = vadd.f32 %v1701_v48, %v754_v7  ;;  %v970_v21 = vmax.f32 %v938_v16, 0.0 }
  0xf6   : > { %v955_v12 = vmax.f32 %v923_v9, 0.0 }
  0xf7   : > { %v704_v15 = vpop.f32.mrf.mxu2  ;;  %v763_v19 = vpop.f32.mrf.mxu1 }
  0xf8   : > { %v1415_v14 = vpack.c.bf16 %v955_v12, %v954_v11  ;;  %v794_v17 = vadd.f32 %v793_v63, %v704_v15 }
  0xf9   : > { %v667_v18 = vpop.f32.mrf.mxu0 }
  0xfa   : > { %1475 = vst [vmem:[%s1711_s21 + $0x20] sm:$0xff] %v1415_v14   ;;  %v939_v20 = vadd.f32 %v1701_v48, %v794_v17  ;;  %v757_v23 = vadd.f32 %v756_v47, %v667_v18  ;;  %v803_v54 = vpop.f32.mrf.mxu3 }
  0xfc   : > { %v971_v22 = vmax.f32 %v939_v20, 0.0  ;;  %v924_v28 = vadd.f32 %v1701_v48, %v757_v23 }
  0xfe   : > { %v1455_v24 = vpack.c.bf16 %v971_v22, %v970_v21  ;;  %v956_v33 = vmax.f32 %v924_v28, 0.0 }
  0xff   : > { %v707_v25 = vpop.f32.mrf.mxu2  ;;  %v766_v30 = vpop.f32.mrf.mxu1 }
 0x100   : > { %1483 = vst [vmem:[%s1711_s21 + $0x60] sm:$0xff] %v1455_v24   ;;  %v797_v32 = vadd.f32 %v796_v13, %v707_v25 }
 0x101   : > { %v669_v27 = vpop.f32.mrf.mxu0 }
 0x102   : > { %v759_v29 = vadd.f32 %v758_v61, %v669_v27  ;;  %v940_v37 = vadd.f32 %v1701_v48, %v797_v32 }
 0x104   : > { %v925_v31 = vadd.f32 %v1701_v48, %v759_v29  ;;  %v972_v43 = vmax.f32 %v940_v37, 0.0 }
 0x106   : > { %v957_v34 = vmax.f32 %v925_v31, 0.0 }
 0x107   : > { %v709_v36 = vpop.f32.mrf.mxu2  ;;  %v768_v41 = vpop.f32.mrf.mxu1 }
 0x108   : > { %v1420_v35 = vpack.c.bf16 %v957_v34, %v956_v33  ;;  %v799_v38 = vadd.f32 %v798_v26, %v709_v36 }
 0x109   : > { %v672_v39 = vpop.f32.mrf.mxu0 }
 0x10a   : > { %1476 = vst [vmem:[%s1711_s21 + $0x28] sm:$0xff] %v1420_v35   ;;  %v941_v42 = vadd.f32 %v1701_v48, %v799_v38  ;;  %v762_v45 = vadd.f32 %v761_v8, %v672_v39  ;;  %v806_v8 = vpop.f32.mrf.mxu3 }
 0x10c   : > { %v973_v44 = vmax.f32 %v941_v42, 0.0  ;;  %v926_v51 = vadd.f32 %v1701_v48, %v762_v45 }
 0x10e   : > { %v1460_v46 = vpack.c.bf16 %v973_v44, %v972_v43  ;;  %v958_v57 = vmax.f32 %v926_v51, 0.0 }
 0x10f   : > { %v712_v47 = vpop.f32.mrf.mxu2  ;;  %v771_v53 = vpop.f32.mrf.mxu1 }
 0x110   : > { %1484 = vst [vmem:[%s1711_s21 + $0x68] sm:$0xff] %v1460_v46   ;;  %v802_v56 = vadd.f32 %v801_v40, %v712_v47  ;;  %v772_v60 = vadd.f32 %v771_v53, %v1703_v49 }
 0x111   : > { %v674_v50 = vpop.f32.mrf.mxu0 }
 0x112   : > { %v764_v52 = vadd.f32 %v763_v19, %v674_v50  ;;  %v942_v63 = vadd.f32 %v1701_v48, %v802_v56  ;;  %v930_v3 = vadd.f32 %v1701_v48, %v772_v60  ;;  %v808_v21 = vpop.f32.mrf.mxu3 }
 0x114   : > { %v927_v55 = vadd.f32 %v1701_v48, %v764_v52  ;;  %v974_v6 = vmax.f32 %v942_v63, 0.0  ;;  %v962_v10 = vmax.f32 %v930_v3, 0.0 }
 0x116   : > { %v959_v58 = vmax.f32 %v927_v55, 0.0 }
 0x117   : > { %v714_v62 = vpop.f32.mrf.mxu2  ;;  %v773_v2 = vpop.f32.mrf.mxu1 }
 0x118   : > { %v1425_v61 = vpack.c.bf16 %v959_v58, %v958_v57  ;;  %v804_v0 = vadd.f32 %v803_v54, %v714_v62  ;;  %v774_v5 = vadd.f32 %v773_v2, %v1713_v59 }
 0x119   : > { %v677_v1 = vpop.f32.mrf.mxu0 }
 0x11a   : > { %1477 = vst [vmem:[%s1711_s21 + $0x30] sm:$0xff] %v1425_v61   ;;  %v943_v4 = vadd.f32 %v1701_v48, %v804_v0  ;;  %v931_v49 = vadd.f32 %v1701_v48, %v774_v5  ;;  %v767_v9 = vadd.f32 %v766_v30, %v677_v1 }
 0x11c   : > { %v975_v7 = vmax.f32 %v943_v4, 0.0  ;;  %v963_v12 = vmax.f32 %v931_v49, 0.0  ;;  %v928_v16 = vadd.f32 %v1701_v48, %v767_v9 }
 0x11e   : > { %v1465_v11 = vpack.c.bf16 %v975_v7, %v974_v6  ;;  %v1435_v14 = vpack.c.bf16 %v963_v12, %v962_v10  ;;  %v960_v19 = vmax.f32 %v928_v16, 0.0 }
 0x11f   : > { %v717_v13 = vpop.f32.mrf.mxu2 }
 0x120   : > { %1485 = vst [vmem:[%s1711_s21 + $0x70] sm:$0xff] %v1465_v11   ;;  %v807_v18 = vadd.f32 %v806_v8, %v717_v13 }
 0x121   : > { %v679_v15 = vpop.f32.mrf.mxu0  ;;  %1479 = vst [vmem:[%s1711_s21 + $0x40] sm:$0xff] %v1435_v14  }
 0x122   : > { %v769_v17 = vadd.f32 %v768_v41, %v679_v15  ;;  %v944_v24 = vadd.f32 %v1701_v48, %v807_v18 }
 0x124   : > { %v929_v59 = vadd.f32 %v1701_v48, %v769_v17  ;;  %v976_v27 = vmax.f32 %v944_v24, 0.0 }
 0x126   : > { %v961_v20 = vmax.f32 %v929_v59, 0.0 }
 0x127   : > { %v719_v23 = vpop.f32.mrf.mxu2 }
 0x128   : > { %v1430_v22 = vpack.c.bf16 %v961_v20, %v960_v19  ;;  %v809_v25 = vadd.f32 %v808_v21, %v719_v23 }
 0x12a   : > { %1478 = vst [vmem:[%s1711_s21 + $0x38] sm:$0xff] %v1430_v22   ;;  %v945_v26 = vadd.f32 %v1701_v48, %v809_v25 }
 0x12c   : > { %v977_v28 = vmax.f32 %v945_v26, 0.0 }
 0x12e   : > { %v1470_v29 = vpack.c.bf16 %v977_v28, %v976_v27 }
 0x130   : > { %1486 = vst [vmem:[%s1711_s21 + $0x78] sm:$0xff] %v1470_v29  }
 0x131 PF: > { %s13_s14 = sadd.s32 1, %s1543_s14   ;;  %s1776_s12 = smov %s1539_s13 }
 0x132   : > { %p10_p5 = scmp.ge.s32.totalorder %s13_s14, 4   ;;  %s1777_s13 = smov %s1779_s15 }
 0x134   :  { %12 = sbr.rel (!%p10_p5) target bundleno = 2 (0x2), region = 76 }

</bundles_post_ra>
